<compile_context>
chip_gen: v7x
topology: tpu7x:2x2x1
jax: 0.10.0
libtpu: 0.0.40
codegen_flags: <defaults>
</compile_context>

<pallas_src>
import functools

import jax
import jax.numpy as jnp
from jax.experimental import pallas as pl
from jax.experimental.pallas import tpu as pltpu

LANE = 128
SUBLANE = 8


def _make_divisible(v, divisor=1, min_value=None):
    if min_value is None:
        min_value = divisor
    new_v = max(min_value, int(v + divisor / 2) // divisor * divisor)
    if new_v < 0.9 * v:
        new_v += divisor
    return new_v


def _round_up(x, m):
    return (x + m - 1) // m * m


def _largest_divisor_leq(n, limit):
    limit = max(1, min(n, limit))
    for d in range(limit, 0, -1):
        if n % d == 0:
            return d
    return 1


def _dsconv_kernel(
    x_ref,       # ((H+2)*Wp, Cp) bf16  zero-padded NHWC input, rows flattened with Wp (8-aligned) stride
    dw_w_ref,    # (3, 3, Cp)     f32   depthwise weights, BN1 scale pre-folded (tiny -> kept f32)
    b1_ref,      # (1, Cp)        f32   folded BN1 bias
    se_w1_ref,   # (Cp, Crp)      bf16  SE reduce weight
    se_b1_ref,   # (1, Crp)       f32   SE reduce bias
    se_w2_ref,   # (Crp, Cp)      bf16  SE expand weight
    se_b2_ref,   # (1, Cp)        f32   SE expand bias (padded lanes MUST stay 0 -> inert gate rows)
    pw_w_ref,    # (Cp, Cop)      bf16  pointwise 1x1 weight, BN2 scale pre-folded
    b2_ref,      # (1, Cop)       f32   folded BN2 bias
    o_ref,       # (H, W, Cop)    bf16
    y_ref,       # VMEM scratch (H, W, Cp) bf16 -- DW+BN1+ReLU activations
    sum_ref,     # VMEM scratch (1, Cp) f32     -- running channel sum for the SE pool
    *,
    H, W, Wp, Cp, Cop, RS, R3, fold_gate, has_residual,
):
    f32 = jnp.float32
    SEG = RS * Wp  # flattened rows per phase-1 strip segment (multiple of 8)

    # ---------------- phase 1: depthwise 3x3 (stride 1, 'same') + BN1(bias) + ReLU ----------------
    sum_ref[...] = jnp.zeros_like(sum_ref)
    b1 = b1_ref[...]                                                   # loop-invariant, hoisted
    wtap = [[dw_w_ref[kh, kw, :] for kw in range(3)] for kh in range(3)]  # 9 (Cp,) f32 vectors

    @pl.loop(0, H // RS)
    def _(i):
        r0 = pl.multiple_of(i * RS, RS)
        acc = jnp.zeros((SEG, Cp), f32)
        for kh in range(3):
            # One aligned full-width load per tap row; kw shifts are XLU sublane rolls on
            # in-register data (no misaligned vector loads).
            start = pl.multiple_of((r0 + kh) * Wp, SUBLANE)
            seg = x_ref[pl.ds(start, SEG), :].astype(f32)              # (SEG, Cp)
            for kw in range(3):
                tap = seg if kw == 0 else pltpu.roll(seg, shift=SEG - kw, axis=0)
                acc = acc + tap * wtap[kh][kw]
        # Columns >= W of each Wp-row group hold wrapped/padded garbage; slice them off.
        y = acc.reshape(RS, Wp, Cp)[:, :W, :] + b1                     # BN1 (scale folded into dw_w)
        y = jnp.maximum(y, 0.0)
        y_ref[pl.ds(r0, RS)] = y.astype(y_ref.dtype)
        sum_ref[...] += jnp.sum(y, axis=(0, 1)).reshape(1, Cp)

    # ---------------- phase 2: SqueezeExcite gate (tiny MXU matmuls, latency only) ----------------
    s = sum_ref[...] * (1.0 / float(H * W))                            # (1, Cp) spatial mean
    r = jnp.dot(s, se_w1_ref[...].astype(f32), preferred_element_type=f32) + se_b1_ref[...]
    r = jnp.maximum(r, 0.0)
    e = jnp.dot(r, se_w2_ref[...].astype(f32), preferred_element_type=f32) + se_b2_ref[...]
    gate = jax.nn.sigmoid(e)                                           # (1, Cp) f32

    if fold_gate:
        # (y*g) @ Wpw == y @ (g[:,None]*Wpw): cheaper when H*W > Cout.
        w_eff = (pw_w_ref[...].astype(f32) * gate.reshape(Cp, 1)).astype(jnp.bfloat16)
    else:
        w_eff = pw_w_ref[...]                                          # bf16; gate applied per strip
    b2 = b2_ref[...]

    # ---------------- phase 3: pointwise 1x1 (MXU) + BN2 (+ residual), R3-row strips ---------------
    @pl.loop(0, H // R3)
    def _(j):
        r0 = pl.multiple_of(j * R3, R3)
        ys = y_ref[pl.ds(r0, R3)]                                      # (R3, W, Cp) bf16
        if not fold_gate:
            ys = (ys.astype(f32) * gate).astype(jnp.bfloat16)
        z = jnp.dot(ys.reshape(R3 * W, Cp), w_eff,
                    preferred_element_type=f32).reshape(R3, W, Cop)
        z = z + b2                                                     # BN2 bias; act2 = Identity
        if has_residual:
            # Residual = interior of the padded input, re-read per strip (aligned load + roll).
            start = pl.multiple_of((r0 + 1) * Wp, SUBLANE)
            seg = x_ref[pl.ds(start, R3 * Wp), :].astype(f32)
            res = pltpu.roll(seg, shift=R3 * Wp - 1, axis=0)
            z = z + res.reshape(R3, Wp, Cp)[:, :W, :]                  # Cp == Cop on this path
        o_ref[pl.ds(r0, R3)] = z.astype(o_ref.dtype)


def depthwise_separable_conv(x_nchw, params):
    """x_nchw: (N, C, H, W) float32. Returns (N, Co, H, W). Matches the PyTorch module."""
    N, C, H, W = x_nchw.shape
    Co = params["pw_w"].shape[1]
    Cr = params["se_w1"].shape[1]

    Cp = _round_up(C, LANE)
    Cop = _round_up(Co, LANE)
    Crp = _round_up(Cr, LANE)
    Wp = _round_up(W + 2, SUBLANE)          # padded width, sublane-aligned

    has_residual = (C == Co)                # stride == 1, noskip == False
    if has_residual:
        assert Cp == Cop, "residual path assumes in_chs == out_chs (padded alike)"
    fold_gate = (H * W >= Cop)              # fold SE gate into PW weights only when it's cheaper

    # Strip sizes: phase-1 f32 accumulator ~<= 96 KiB; phase-3 strip gives ~256-512 MXU rows.
    RS = _largest_divisor_leq(H, max(1, (96 * 1024) // (Wp * Cp * 4)))
    R3 = _largest_divisor_leq(H, max(1, 512 // W))
    assert H % RS == 0 and H % R3 == 0

    cdt = jnp.bfloat16                      # HBM / MXU dtype (accumulation stays f32 in-kernel)

    # NCHW -> NHWC, pad spatial ('same' 3x3 + sublane-aligned W) and channels to lane multiples,
    # cast to bf16, flatten rows so every in-kernel row window is a 2D, 8-aligned slice.
    x_nhwc = jnp.transpose(x_nchw, (0, 2, 3, 1))
    x_pad = jnp.pad(x_nhwc, ((0, 0), (1, 1), (1, Wp - W - 1), (0, Cp - C))).astype(cdt)
    x_flat = x_pad.reshape(N, (H + 2) * Wp, Cp)

    def pad2(a, r, c):
        return jnp.pad(a, ((0, r - a.shape[0]), (0, c - a.shape[1])))

    # Constant-fold BN scales into the conv weights (a real pipeline does this offline, once).
    # Padded channels are mathematically inert: zero dw/pw weights, zero biases (se_b2 padding must
    # stay zero so gate=sigmoid(0)=0.5 only ever multiplies zero weight rows).
    dw_w = jnp.pad(params["dw_w"] * params["bn1_scale"][0],
                   ((0, 0), (0, 0), (0, Cp - C))).astype(jnp.float32)
    b1 = pad2(params["bn1_bias"], 1, Cp).astype(jnp.float32)
    se_w1 = pad2(params["se_w1"], Cp, Crp).astype(cdt)
    se_b1 = pad2(params["se_b1"], 1, Crp).astype(jnp.float32)
    se_w2 = pad2(params["se_w2"], Crp, Cp).astype(cdt)
    se_b2 = pad2(params["se_b2"], 1, Cp).astype(jnp.float32)
    pw_wp = pad2(params["pw_w"] * params["bn2_scale"], Cp, Cop).astype(cdt)
    b2 = pad2(params["bn2_bias"], 1, Cop).astype(jnp.float32)

    # Generation-aware VMEM budget: blocks (double-buffered) + scratch + weights + strip live values.
    bf2, f4 = 2, 4
    need = (
        2 * (H + 2) * Wp * Cp * bf2                 # input block
        + 2 * H * W * Cop * bf2                     # output block
        + H * W * Cp * bf2 + Cp * f4                # y / sum scratch
        + 2 * (9 * Cp * f4 + Cp * f4 + Cp * Crp * bf2 + Crp * f4
               + Crp * Cp * bf2 + Cp * f4 + Cp * Cop * bf2 + Cop * f4)
        + 3 * RS * Wp * Cp * f4                     # phase-1 acc + tap segment
        + 3 * R3 * W * max(Cp, Cop) * f4            # phase-3 y strip / z / residual
        + Cp * Cop * f4                             # gate-folded weight copy
    )
    try:
        vmem_cap = int(pltpu.get_tpu_info().vmem_capacity_bytes)
    except Exception:
        vmem_cap = 64 << 20                         # conservative (v7x-sized) fallback
    headroom = (8 << 20) if vmem_cap <= (64 << 20) else (20 << 20)
    vmem_limit = int(min(max(2 * need, 32 << 20), vmem_cap - headroom))

    kernel = functools.partial(
        _dsconv_kernel, H=H, W=W, Wp=Wp, Cp=Cp, Cop=Cop,
        RS=RS, R3=R3, fold_gate=fold_gate, has_residual=has_residual)

    out_nhwc = pl.pallas_call(
        kernel,
        out_shape=jax.ShapeDtypeStruct((N, H, W, Cop), cdt),
        grid_spec=pltpu.PrefetchScalarGridSpec(
            num_scalar_prefetch=0,
            grid=(N,),
            in_specs=[
                pl.BlockSpec((None, (H + 2) * Wp, Cp), lambda n: (n, 0, 0)),
                pl.BlockSpec((3, 3, Cp), lambda n: (0, 0, 0)),
                pl.BlockSpec((1, Cp), lambda n: (0, 0)),
                pl.BlockSpec((Cp, Crp), lambda n: (0, 0)),
                pl.BlockSpec((1, Crp), lambda n: (0, 0)),
                pl.BlockSpec((Crp, Cp), lambda n: (0, 0)),
                pl.BlockSpec((1, Cp), lambda n: (0, 0)),
                pl.BlockSpec((Cp, Cop), lambda n: (0, 0)),
                pl.BlockSpec((1, Cop), lambda n: (0, 0)),
            ],
            out_specs=pl.BlockSpec((None, H, W, Cop), lambda n: (n, 0, 0, 0)),
            scratch_shapes=[
                pltpu.VMEM((H, W, Cp), cdt),
                pltpu.VMEM((1, Cp), jnp.float32),
            ],
        ),
        compiler_params=pltpu.CompilerParams(
            dimension_semantics=("parallel",),
            vmem_limit_bytes=vmem_limit,
        ),
    )(x_flat, dw_w, b1, se_w1, se_b1, se_w2, se_b2, pw_wp, b2)

    return jnp.transpose(out_nhwc[..., :Co], (0, 3, 1, 2)).astype(x_nchw.dtype)


def _reference(x_nchw, params):
    """Pure-JAX f32 reference with identical semantics (NCHW in/out, unpadded params)."""
    x = jnp.transpose(x_nchw, (0, 2, 3, 1)).astype(jnp.float32)   # NHWC
    N, H, W, C = x.shape
    xpad = jnp.pad(x, ((0, 0), (1, 1), (1, 1), (0, 0)))
    acc = jnp.zeros_like(x)
    for kh in range(3):
        for kw in range(3):
            acc = acc + xpad[:, kh:kh + H, kw:kw + W, :] * params["dw_w"][kh, kw, :]
    y = acc * params["bn1_scale"][0] + params["bn1_bias"][0]
    y = jnp.maximum(y, 0.0)
    s = jnp.mean(y, axis=(1, 2))                                   # (N, C)
    r = jnp.maximum(s @ params["se_w1"] + params["se_b1"][0], 0.0)
    g = jax.nn.sigmoid(r @ params["se_w2"] + params["se_b2"][0])   # (N, C)
    y = y * g[:, None, None, :]
    z = jnp.einsum("nhwc,co->nhwo", y, params["pw_w"])
    z = z * params["bn2_scale"][0] + params["bn2_bias"][0]
    z = z + x
    return jnp.transpose(z, (0, 3, 1, 2))


def _init_params(key, in_chs, out_chs, se_ratio=0.25, eps=1e-5):
    reduced_chs = _make_divisible(in_chs * se_ratio, 1)
    ks = jax.random.split(key, 12)
    f32 = jnp.float32

    dw_w = jax.random.normal(ks[0], (3, 3, in_chs), f32) * 0.1
    pw_w = jax.random.normal(ks[1], (in_chs, out_chs), f32) * 0.1

    # BatchNorm (eval mode) params, folded into scale/bias.
    g1 = 1.0 + 0.1 * jax.random.normal(ks[2], (in_chs,), f32)
    b1 = 0.1 * jax.random.normal(ks[3], (in_chs,), f32)
    m1 = 0.1 * jax.random.normal(ks[4], (in_chs,), f32)
    v1 = 1.0 + 0.1 * jax.random.uniform(ks[5], (in_chs,), f32)
    s1 = g1 / jnp.sqrt(v1 + eps)

    g2 = 1.0 + 0.1 * jax.random.normal(ks[6], (out_chs,), f32)
    b2 = 0.1 * jax.random.normal(ks[7], (out_chs,), f32)
    m2 = 0.1 * jax.random.normal(ks[8], (out_chs,), f32)
    v2 = 1.0 + 0.1 * jax.random.uniform(ks[9], (out_chs,), f32)
    s2 = g2 / jnp.sqrt(v2 + eps)

    se_w1 = jax.random.normal(ks[10], (in_chs, reduced_chs), f32) * 0.1
    se_w2 = jax.random.normal(ks[11], (reduced_chs, in_chs), f32) * 0.1

    return dict(
        dw_w=dw_w,
        bn1_scale=s1.reshape(1, -1), bn1_bias=(b1 - m1 * s1).reshape(1, -1),
        se_w1=se_w1, se_b1=jnp.zeros((1, reduced_chs), f32) + 0.01,
        se_w2=se_w2, se_b2=jnp.zeros((1, in_chs), f32) + 0.01,
        pw_w=pw_w,
        bn2_scale=s2.reshape(1, -1), bn2_bias=(b2 - m2 * s2).reshape(1, -1),
    )


if __name__ == "__main__":
    key = jax.random.PRNGKey(0)
    kx, kp = jax.random.split(key)

    N, C, H, W = 2, 4, 16, 16          # in_chs == out_chs, stride 1 -> residual path active
    x = jax.random.normal(kx, (N, C, H, W), jnp.float32)
    params = _init_params(kp, in_chs=C, out_chs=C, se_ratio=0.25)

    out = depthwise_separable_conv(x, params)
    out = jax.block_until_ready(out)
    assert out.shape == (N, C, H, W)

    # Compare against a reference evaluated on bf16-rounded activations / MXU weights (the kernel's
    # intentional HBM/MXU dtype), so the check isolates kernel correctness from quantization.
    rnd = lambda a: a.astype(jnp.bfloat16).astype(jnp.float32)   # noqa: E731
    params_r = dict(params)
    for k in ("se_w1", "se_w2", "pw_w"):
        params_r[k] = rnd(params[k])
    ref = _reference(rnd(x), params_r)

    assert jnp.allclose(out, ref, atol=5e-2, rtol=1e-2), "mismatch vs reference"

    print("KERNEL_OK")
</pallas_src>

<mosaic_0001>
module attributes {stable_mosaic.version = 11 : i64} {
  func.func @_dsconv_kernel(%arg0: i32, %arg1: memref<1x432x128xbf16, #tpu.memory_space<vmem>>, %arg2: memref<3x3x128xf32, #tpu.memory_space<vmem>>, %arg3: memref<1x128xf32, #tpu.memory_space<vmem>>, %arg4: memref<128x128xbf16, #tpu.memory_space<vmem>>, %arg5: memref<1x128xf32, #tpu.memory_space<vmem>>, %arg6: memref<128x128xbf16, #tpu.memory_space<vmem>>, %arg7: memref<1x128xf32, #tpu.memory_space<vmem>>, %arg8: memref<128x128xbf16, #tpu.memory_space<vmem>>, %arg9: memref<1x128xf32, #tpu.memory_space<vmem>>, %arg10: memref<1x16x16x128xbf16, #tpu.memory_space<vmem>>, %arg11: memref<16x16x128xbf16, #tpu.memory_space<vmem>>, %arg12: memref<1x128xf32, #tpu.memory_space<vmem>>) attributes {dimension_semantics = [#tpu.dimension_semantics<parallel>], iteration_bounds = array<i64: 2>, scalar_prefetch = 0 : i64, scratch_operands = 2 : i64, tpu.core_type = #tpu.core_type<tc>, window_params = [{transform_indices = @transform_0, window_bounds = array<i64: 1, 432, 128>}, {pipeline_mode = #tpu.pipeline_mode<synchronous>, transform_indices = @transform_1, window_bounds = array<i64: 3, 3, 128>}, {pipeline_mode = #tpu.pipeline_mode<synchronous>, transform_indices = @transform_2, window_bounds = array<i64: 1, 128>}, {pipeline_mode = #tpu.pipeline_mode<synchronous>, transform_indices = @transform_3, window_bounds = array<i64: 128, 128>}, {pipeline_mode = #tpu.pipeline_mode<synchronous>, transform_indices = @transform_4, window_bounds = array<i64: 1, 128>}, {pipeline_mode = #tpu.pipeline_mode<synchronous>, transform_indices = @transform_5, window_bounds = array<i64: 128, 128>}, {pipeline_mode = #tpu.pipeline_mode<synchronous>, transform_indices = @transform_6, window_bounds = array<i64: 1, 128>}, {pipeline_mode = #tpu.pipeline_mode<synchronous>, transform_indices = @transform_7, window_bounds = array<i64: 128, 128>}, {pipeline_mode = #tpu.pipeline_mode<synchronous>, transform_indices = @transform_8, window_bounds = array<i64: 1, 128>}, {transform_indices = @transform_9, window_bounds = array<i64: 1, 16, 16, 128>}]} {
    %cst = arith.constant 0.000000e+00 : f32
    %0 = vector.broadcast %cst : f32 to vector<1x128xf32>
    %c0 = arith.constant 0 : index
    %c0_0 = arith.constant 0 : index
    %1 = vector.load %arg12[%c0, %c0_0] : memref<1x128xf32, #tpu.memory_space<vmem>>, vector<1x128xf32>
    tpu.vector_store %arg12[%c0, %c0_0], %0 {strides = array<i32>} : memref<1x128xf32, #tpu.memory_space<vmem>>, vector<1x128xf32>,
    %c0_1 = arith.constant 0 : index
    %c0_2 = arith.constant 0 : index
    %2 = vector.load %arg3[%c0_1, %c0_2] : memref<1x128xf32, #tpu.memory_space<vmem>>, vector<1x128xf32>
    %c0_3 = arith.constant 0 : index
    %c0_4 = arith.constant 0 : index
    %c0_5 = arith.constant 0 : index
    %3 = vector.load %arg2[%c0_3, %c0_4, %c0_5] : memref<3x3x128xf32, #tpu.memory_space<vmem>>, vector<1x1x128xf32>
    %4 = vector.shape_cast %3 : vector<1x1x128xf32> to vector<128xf32>
    %c0_6 = arith.constant 0 : index
    %c1 = arith.constant 1 : index
    %c0_7 = arith.constant 0 : index
    %5 = vector.load %arg2[%c0_6, %c1, %c0_7] : memref<3x3x128xf32, #tpu.memory_space<vmem>>, vector<1x1x128xf32>
    %6 = vector.shape_cast %5 : vector<1x1x128xf32> to vector<128xf32>
    %c0_8 = arith.constant 0 : index
    %c2 = arith.constant 2 : index
    %c0_9 = arith.constant 0 : index
    %7 = vector.load %arg2[%c0_8, %c2, %c0_9] : memref<3x3x128xf32, #tpu.memory_space<vmem>>, vector<1x1x128xf32>
    %8 = vector.shape_cast %7 : vector<1x1x128xf32> to vector<128xf32>
    %c1_10 = arith.constant 1 : index
    %c0_11 = arith.constant 0 : index
    %c0_12 = arith.constant 0 : index
    %9 = vector.load %arg2[%c1_10, %c0_11, %c0_12] : memref<3x3x128xf32, #tpu.memory_space<vmem>>, vector<1x1x128xf32>
    %10 = vector.shape_cast %9 : vector<1x1x128xf32> to vector<128xf32>
    %c1_13 = arith.constant 1 : index
    %c1_14 = arith.constant 1 : index
    %c0_15 = arith.constant 0 : index
    %11 = vector.load %arg2[%c1_13, %c1_14, %c0_15] : memref<3x3x128xf32, #tpu.memory_space<vmem>>, vector<1x1x128xf32>
    %12 = vector.shape_cast %11 : vector<1x1x128xf32> to vector<128xf32>
    %c1_16 = arith.constant 1 : index
    %c2_17 = arith.constant 2 : index
    %c0_18 = arith.constant 0 : index
    %13 = vector.load %arg2[%c1_16, %c2_17, %c0_18] : memref<3x3x128xf32, #tpu.memory_space<vmem>>, vector<1x1x128xf32>
    %14 = vector.shape_cast %13 : vector<1x1x128xf32> to vector<128xf32>
    %c2_19 = arith.constant 2 : index
    %c0_20 = arith.constant 0 : index
    %c0_21 = arith.constant 0 : index
    %15 = vector.load %arg2[%c2_19, %c0_20, %c0_21] : memref<3x3x128xf32, #tpu.memory_space<vmem>>, vector<1x1x128xf32>
    %16 = vector.shape_cast %15 : vector<1x1x128xf32> to vector<128xf32>
    %c2_22 = arith.constant 2 : index
    %c1_23 = arith.constant 1 : index
    %c0_24 = arith.constant 0 : index
    %17 = vector.load %arg2[%c2_22, %c1_23, %c0_24] : memref<3x3x128xf32, #tpu.memory_space<vmem>>, vector<1x1x128xf32>
    %18 = vector.shape_cast %17 : vector<1x1x128xf32> to vector<128xf32>
    %c2_25 = arith.constant 2 : index
    %c2_26 = arith.constant 2 : index
    %c0_27 = arith.constant 0 : index
    %19 = vector.load %arg2[%c2_25, %c2_26, %c0_27] : memref<3x3x128xf32, #tpu.memory_space<vmem>>, vector<1x1x128xf32>
    %20 = vector.shape_cast %19 : vector<1x1x128xf32> to vector<128xf32>
    %c0_i32 = arith.constant 0 : i32
    %c2_i32 = arith.constant 2 : i32
    %21 = arith.addi %c0_i32, %c2_i32 : i32
    %c1_i32 = arith.constant 1 : i32
    scf.for %arg13 = %c0_i32 to %21 step %c1_i32  : i32 {
      %c1_i32_61 = arith.constant 1 : i32
      %77 = arith.muli %arg13, %c1_i32_61 : i32
      %c0_i32_62 = arith.constant 0 : i32
      %78 = arith.addi %c0_i32_62, %77 : i32
      %c8_i32 = arith.constant 8 : i32
      %79 = arith.muli %78, %c8_i32 : i32
      %80 = tpu.assume_multiple %79, 8 : i32
      %cst_63 = arith.constant 0.000000e+00 : f32
      %81 = vector.broadcast %cst_63 : f32 to vector<192x128xf32>
      %c0_i32_64 = arith.constant 0 : i32
      %82 = arith.addi %80, %c0_i32_64 : i32
      %c24_i32_65 = arith.constant 24 : i32
      %83 = arith.muli %82, %c24_i32_65 : i32
      %84 = tpu.assume_multiple %83, 8 : i32
      %c0_66 = arith.constant 0 : index
      %85 = arith.index_cast %84 : i32 to index
      %c0_67 = arith.constant 0 : index
      %86 = vector.load %arg1[%c0_66, %85, %c0_67] : memref<1x432x128xbf16, #tpu.memory_space<vmem>>, vector<1x192x128xbf16>
      %87 = vector.shape_cast %86 : vector<1x192x128xbf16> to vector<192x128xbf16>
      %88 = arith.extf %87 : vector<192x128xbf16> to vector<192x128xf32>
      %89 = vector.shape_cast %4 : vector<128xf32> to vector<1x128xf32>
      %90 = vector.broadcast %89 : vector<1x128xf32> to vector<192x128xf32>
      %91 = arith.mulf %88, %90 : vector<192x128xf32>
      %92 = arith.addf %81, %91 : vector<192x128xf32>
      %c191_i32 = arith.constant 191 : i32
      %93 = tpu.dynamic_rotate %88 by %c191_i32 dim 0 : vector<192x128xf32>, i32 -> vector<192x128xf32>
      %94 = vector.shape_cast %6 : vector<128xf32> to vector<1x128xf32>
      %95 = vector.broadcast %94 : vector<1x128xf32> to vector<192x128xf32>
      %96 = arith.mulf %93, %95 : vector<192x128xf32>
      %97 = arith.addf %92, %96 : vector<192x128xf32>
      %c190_i32 = arith.constant 190 : i32
      %98 = tpu.dynamic_rotate %88 by %c190_i32 dim 0 : vector<192x128xf32>, i32 -> vector<192x128xf32>
      %99 = vector.shape_cast %8 : vector<128xf32> to vector<1x128xf32>
      %100 = vector.broadcast %99 : vector<1x128xf32> to vector<192x128xf32>
      %101 = arith.mulf %98, %100 : vector<192x128xf32>
      %102 = arith.addf %97, %101 : vector<192x128xf32>
      %c1_i32_68 = arith.constant 1 : i32
      %103 = arith.addi %80, %c1_i32_68 : i32
      %c24_i32_69 = arith.constant 24 : i32
      %104 = arith.muli %103, %c24_i32_69 : i32
      %105 = tpu.assume_multiple %104, 8 : i32
      %c0_70 = arith.constant 0 : index
      %106 = arith.index_cast %105 : i32 to index
      %c0_71 = arith.constant 0 : index
      %107 = vector.load %arg1[%c0_70, %106, %c0_71] : memref<1x432x128xbf16, #tpu.memory_space<vmem>>, vector<1x192x128xbf16>
      %108 = vector.shape_cast %107 : vector<1x192x128xbf16> to vector<192x128xbf16>
      %109 = arith.extf %108 : vector<192x128xbf16> to vector<192x128xf32>
      %110 = vector.shape_cast %10 : vector<128xf32> to vector<1x128xf32>
      %111 = vector.broadcast %110 : vector<1x128xf32> to vector<192x128xf32>
      %112 = arith.mulf %109, %111 : vector<192x128xf32>
      %113 = arith.addf %102, %112 : vector<192x128xf32>
      %c191_i32_72 = arith.constant 191 : i32
      %114 = tpu.dynamic_rotate %109 by %c191_i32_72 dim 0 : vector<192x128xf32>, i32 -> vector<192x128xf32>
      %115 = vector.shape_cast %12 : vector<128xf32> to vector<1x128xf32>
      %116 = vector.broadcast %115 : vector<1x128xf32> to vector<192x128xf32>
      %117 = arith.mulf %114, %116 : vector<192x128xf32>
      %118 = arith.addf %113, %117 : vector<192x128xf32>
      %c190_i32_73 = arith.constant 190 : i32
      %119 = tpu.dynamic_rotate %109 by %c190_i32_73 dim 0 : vector<192x128xf32>, i32 -> vector<192x128xf32>
      %120 = vector.shape_cast %14 : vector<128xf32> to vector<1x128xf32>
      %121 = vector.broadcast %120 : vector<1x128xf32> to vector<192x128xf32>
      %122 = arith.mulf %119, %121 : vector<192x128xf32>
      %123 = arith.addf %118, %122 : vector<192x128xf32>
      %c2_i32_74 = arith.constant 2 : i32
      %124 = arith.addi %80, %c2_i32_74 : i32
      %c24_i32_75 = arith.constant 24 : i32
      %125 = arith.muli %124, %c24_i32_75 : i32
      %126 = tpu.assume_multiple %125, 8 : i32
      %c0_76 = arith.constant 0 : index
      %127 = arith.index_cast %126 : i32 to index
      %c0_77 = arith.constant 0 : index
      %128 = vector.load %arg1[%c0_76, %127, %c0_77] : memref<1x432x128xbf16, #tpu.memory_space<vmem>>, vector<1x192x128xbf16>
      %129 = vector.shape_cast %128 : vector<1x192x128xbf16> to vector<192x128xbf16>
      %130 = arith.extf %129 : vector<192x128xbf16> to vector<192x128xf32>
      %131 = vector.shape_cast %16 : vector<128xf32> to vector<1x128xf32>
      %132 = vector.broadcast %131 : vector<1x128xf32> to vector<192x128xf32>
      %133 = arith.mulf %130, %132 : vector<192x128xf32>
      %134 = arith.addf %123, %133 : vector<192x128xf32>
      %c191_i32_78 = arith.constant 191 : i32
      %135 = tpu.dynamic_rotate %130 by %c191_i32_78 dim 0 : vector<192x128xf32>, i32 -> vector<192x128xf32>
      %136 = vector.shape_cast %18 : vector<128xf32> to vector<1x128xf32>
      %137 = vector.broadcast %136 : vector<1x128xf32> to vector<192x128xf32>
      %138 = arith.mulf %135, %137 : vector<192x128xf32>
      %139 = arith.addf %134, %138 : vector<192x128xf32>
      %c190_i32_79 = arith.constant 190 : i32
      %140 = tpu.dynamic_rotate %130 by %c190_i32_79 dim 0 : vector<192x128xf32>, i32 -> vector<192x128xf32>
      %141 = vector.shape_cast %20 : vector<128xf32> to vector<1x128xf32>
      %142 = vector.broadcast %141 : vector<1x128xf32> to vector<192x128xf32>
      %143 = arith.mulf %140, %142 : vector<192x128xf32>
      %144 = arith.addf %139, %143 : vector<192x128xf32>
      %145 = vector.shape_cast %144 : vector<192x128xf32> to vector<8x24x128xf32>
      %146 = vector.extract_strided_slice %145 {offsets = [0, 0, 0], sizes = [8, 16, 128], strides = [1, 1, 1]} : vector<8x24x128xf32> to vector<8x16x128xf32>
      %147 = vector.shape_cast %2 : vector<1x128xf32> to vector<1x1x128xf32>
      %148 = vector.broadcast %147 : vector<1x1x128xf32> to vector<8x16x128xf32>
      %149 = arith.addf %146, %148 : vector<8x16x128xf32>
      %cst_80 = arith.constant 0.000000e+00 : f32
      %150 = vector.broadcast %cst_80 : f32 to vector<8x16x128xf32>
      %151 = arith.maximumf %149, %150 : vector<8x16x128xf32>
      %152 = arith.truncf %151 : vector<8x16x128xf32> to vector<8x16x128xbf16>
      %153 = arith.index_cast %80 : i32 to index
      %c0_81 = arith.constant 0 : index
      %c0_82 = arith.constant 0 : index
      %154 = vector.load %arg11[%153, %c0_81, %c0_82] : memref<16x16x128xbf16, #tpu.memory_space<vmem>>, vector<8x16x128xbf16>
      tpu.vector_store %arg11[%153, %c0_81, %c0_82], %152 {strides = array<i32>} : memref<16x16x128xbf16, #tpu.memory_space<vmem>>, vector<8x16x128xbf16>,
      %c0_83 = arith.constant 0 : index
      %c0_84 = arith.constant 0 : index
      %155 = vector.load %arg12[%c0_83, %c0_84] : memref<1x128xf32, #tpu.memory_space<vmem>>, vector<1x128xf32>
      %cst_85 = arith.constant dense<0.000000e+00> : vector<128xf32>
      %156 = vector.multi_reduction <add>, %151, %cst_85 [0, 1] : vector<8x16x128xf32> to vector<128xf32>
      %157 = vector.shape_cast %156 : vector<128xf32> to vector<1x128xf32>
      %158 = arith.addf %155, %157 : vector<1x128xf32>
      %c0_86 = arith.constant 0 : index
      %c0_87 = arith.constant 0 : index
      %159 = vector.load %arg12[%c0_86, %c0_87] : memref<1x128xf32, #tpu.memory_space<vmem>>, vector<1x128xf32>
      tpu.vector_store %arg12[%c0_86, %c0_87], %158 {strides = array<i32>} : memref<1x128xf32, #tpu.memory_space<vmem>>, vector<1x128xf32>,
    }
    %c2_i32_28 = arith.constant 2 : i32
    %c0_29 = arith.constant 0 : index
    %c0_30 = arith.constant 0 : index
    %22 = vector.load %arg12[%c0_29, %c0_30] : memref<1x128xf32, #tpu.memory_space<vmem>>, vector<1x128xf32>
    %cst_31 = arith.constant 3.906250e-03 : f32
    %23 = vector.broadcast %cst_31 : f32 to vector<1x128xf32>
    %24 = arith.mulf %22, %23 : vector<1x128xf32>
    %c0_32 = arith.constant 0 : index
    %c0_33 = arith.constant 0 : index
    %25 = vector.load %arg4[%c0_32, %c0_33] : memref<128x128xbf16, #tpu.memory_space<vmem>>, vector<128x128xbf16>
    %26 = arith.extf %25 : vector<128x128xbf16> to vector<128x128xf32>
    %cst_34 = arith.constant dense<0.000000e+00> : vector<1x128xf32>
    %27 = tpu.matmul %24, %26, %cst_34 {dimension_numbers = #tpu.dot_dimension_numbers<[1], [0], [0], [1], [0, 0, 1, 1], [], []>} : vector<1x128xf32>, vector<128x128xf32>, vector<1x128xf32> -> vector<1x128xf32>
    %c0_35 = arith.constant 0 : index
    %c0_36 = arith.constant 0 : index
    %28 = vector.load %arg5[%c0_35, %c0_36] : memref<1x128xf32, #tpu.memory_space<vmem>>, vector<1x128xf32>
    %29 = arith.addf %27, %28 : vector<1x128xf32>
    %cst_37 = arith.constant 0.000000e+00 : f32
    %30 = vector.broadcast %cst_37 : f32 to vector<1x128xf32>
    %31 = arith.maximumf %29, %30 : vector<1x128xf32>
    %c0_38 = arith.constant 0 : index
    %c0_39 = arith.constant 0 : index
    %32 = vector.load %arg6[%c0_38, %c0_39] : memref<128x128xbf16, #tpu.memory_space<vmem>>, vector<128x128xbf16>
    %33 = arith.extf %32 : vector<128x128xbf16> to vector<128x128xf32>
    %cst_40 = arith.constant dense<0.000000e+00> : vector<1x128xf32>
    %34 = tpu.matmul %31, %33, %cst_40 {dimension_numbers = #tpu.dot_dimension_numbers<[1], [0], [0], [1], [0, 0, 1, 1], [], []>} : vector<1x128xf32>, vector<128x128xf32>, vector<1x128xf32> -> vector<1x128xf32>
    %c0_41 = arith.constant 0 : index
    %c0_42 = arith.constant 0 : index
    %35 = vector.load %arg7[%c0_41, %c0_42] : memref<1x128xf32, #tpu.memory_space<vmem>>, vector<1x128xf32>
    %36 = arith.addf %34, %35 : vector<1x128xf32>
    %37 = arith.negf %36 : vector<1x128xf32>
    %38 = math.exp %37 : vector<1x128xf32>
    %cst_43 = arith.constant 1.000000e+00 : f32
    %39 = vector.broadcast %cst_43 : f32 to vector<1x128xf32>
    %40 = arith.addf %39, %38 : vector<1x128xf32>
    %41 = arith.divf %39, %40 : vector<1x128xf32>
    %c0_44 = arith.constant 0 : index
    %c0_45 = arith.constant 0 : index
    %42 = vector.load %arg8[%c0_44, %c0_45] : memref<128x128xbf16, #tpu.memory_space<vmem>>, vector<128x128xbf16>
    %43 = arith.extf %42 : vector<128x128xbf16> to vector<128x128xf32>
    %44 = vector.shape_cast %41 : vector<1x128xf32> to vector<128x1xf32>
    %45 = vector.broadcast %44 : vector<128x1xf32> to vector<128x128xf32>
    %46 = arith.mulf %43, %45 : vector<128x128xf32>
    %47 = arith.truncf %46 : vector<128x128xf32> to vector<128x128xbf16>
    %c0_46 = arith.constant 0 : index
    %c0_47 = arith.constant 0 : index
    %48 = vector.load %arg9[%c0_46, %c0_47] : memref<1x128xf32, #tpu.memory_space<vmem>>, vector<1x128xf32>
    %c0_i32_48 = arith.constant 0 : i32
    %c1_i32_49 = arith.constant 1 : i32
    %49 = arith.muli %c0_i32_48, %c1_i32_49 : i32
    %c0_i32_50 = arith.constant 0 : i32
    %50 = arith.addi %c0_i32_50, %49 : i32
    %c16_i32 = arith.constant 16 : i32
    %51 = arith.muli %50, %c16_i32 : i32
    %52 = tpu.assume_multiple %51, 16 : i32
    %53 = arith.index_cast %52 : i32 to index
    %c0_51 = arith.constant 0 : index
    %c0_52 = arith.constant 0 : index
    %54 = vector.load %arg11[%53, %c0_51, %c0_52] : memref<16x16x128xbf16, #tpu.memory_space<vmem>>, vector<16x16x128xbf16>
    %55 = vector.shape_cast %54 : vector<16x16x128xbf16> to vector<256x128xbf16>
    %cst_53 = arith.constant dense<0.000000e+00> : vector<256x128xf32>
    %56 = tpu.matmul %55, %47, %cst_53 {dimension_numbers = #tpu.dot_dimension_numbers<[1], [0], [0], [1], [0, 0, 1, 1], [], []>} : vector<256x128xbf16>, vector<128x128xbf16>, vector<256x128xf32> -> vector<256x128xf32>
    %57 = vector.shape_cast %56 : vector<256x128xf32> to vector<16x16x128xf32>
    %58 = vector.shape_cast %48 : vector<1x128xf32> to vector<1x1x128xf32>
    %59 = vector.broadcast %58 : vector<1x1x128xf32> to vector<16x16x128xf32>
    %60 = arith.addf %57, %59 : vector<16x16x128xf32>
    %c1_i32_54 = arith.constant 1 : i32
    %61 = arith.addi %52, %c1_i32_54 : i32
    %c24_i32 = arith.constant 24 : i32
    %62 = arith.muli %61, %c24_i32 : i32
    %63 = tpu.assume_multiple %62, 8 : i32
    %c0_55 = arith.constant 0 : index
    %64 = arith.index_cast %63 : i32 to index
    %c0_56 = arith.constant 0 : index
    %65 = vector.load %arg1[%c0_55, %64, %c0_56] : memref<1x432x128xbf16, #tpu.memory_space<vmem>>, vector<1x384x128xbf16>
    %66 = vector.shape_cast %65 : vector<1x384x128xbf16> to vector<384x128xbf16>
    %67 = arith.extf %66 : vector<384x128xbf16> to vector<384x128xf32>
    %c383_i32 = arith.constant 383 : i32
    %68 = tpu.dynamic_rotate %67 by %c383_i32 dim 0 : vector<384x128xf32>, i32 -> vector<384x128xf32>
    %69 = vector.shape_cast %68 : vector<384x128xf32> to vector<16x24x128xf32>
    %70 = vector.extract_strided_slice %69 {offsets = [0, 0, 0], sizes = [16, 16, 128], strides = [1, 1, 1]} : vector<16x24x128xf32> to vector<16x16x128xf32>
    %71 = arith.addf %60, %70 : vector<16x16x128xf32>
    %72 = arith.truncf %71 : vector<16x16x128xf32> to vector<16x16x128xbf16>
    %c0_57 = arith.constant 0 : index
    %73 = arith.index_cast %52 : i32 to index
    %c0_58 = arith.constant 0 : index
    %c0_59 = arith.constant 0 : index
    %74 = vector.load %arg10[%c0_57, %73, %c0_58, %c0_59] : memref<1x16x16x128xbf16, #tpu.memory_space<vmem>>, vector<1x16x16x128xbf16>
    %75 = vector.shape_cast %74 : vector<1x16x16x128xbf16> to vector<16x16x128xbf16>
    %76 = vector.shape_cast %72 : vector<16x16x128xbf16> to vector<1x16x16x128xbf16>
    tpu.vector_store %arg10[%c0_57, %73, %c0_58, %c0_59], %76 {strides = array<i32>} : memref<1x16x16x128xbf16, #tpu.memory_space<vmem>>, vector<1x16x16x128xbf16>,
    %c1_i32_60 = arith.constant 1 : i32
    return
  }
  func.func @transform_0(%arg0: i32) -> (i32, i32, i32) {
    %c0_i32 = arith.constant 0 : i32
    %c0_i32_0 = arith.constant 0 : i32
    %c0_i32_1 = arith.constant 0 : i32
    return %arg0, %c0_i32, %c0_i32_0 : i32, i32, i32
  }
  func.func @transform_1(%arg0: i32) -> (i32, i32, i32) {
    %c0_i32 = arith.constant 0 : i32
    %c0_i32_0 = arith.constant 0 : i32
    %c0_i32_1 = arith.constant 0 : i32
    %c0_i32_2 = arith.constant 0 : i32
    return %c0_i32, %c0_i32_0, %c0_i32_1 : i32, i32, i32
  }
  func.func @transform_2(%arg0: i32) -> (i32, i32) {
    %c0_i32 = arith.constant 0 : i32
    %c0_i32_0 = arith.constant 0 : i32
    %c0_i32_1 = arith.constant 0 : i32
    return %c0_i32, %c0_i32_0 : i32, i32
  }
  func.func @transform_3(%arg0: i32) -> (i32, i32) {
    %c0_i32 = arith.constant 0 : i32
    %c0_i32_0 = arith.constant 0 : i32
    %c0_i32_1 = arith.constant 0 : i32
    return %c0_i32, %c0_i32_0 : i32, i32
  }
  func.func @transform_4(%arg0: i32) -> (i32, i32) {
    %c0_i32 = arith.constant 0 : i32
    %c0_i32_0 = arith.constant 0 : i32
    %c0_i32_1 = arith.constant 0 : i32
    return %c0_i32, %c0_i32_0 : i32, i32
  }
  func.func @transform_5(%arg0: i32) -> (i32, i32) {
    %c0_i32 = arith.constant 0 : i32
    %c0_i32_0 = arith.constant 0 : i32
    %c0_i32_1 = arith.constant 0 : i32
    return %c0_i32, %c0_i32_0 : i32, i32
  }
  func.func @transform_6(%arg0: i32) -> (i32, i32) {
    %c0_i32 = arith.constant 0 : i32
    %c0_i32_0 = arith.constant 0 : i32
    %c0_i32_1 = arith.constant 0 : i32
    return %c0_i32, %c0_i32_0 : i32, i32
  }
  func.func @transform_7(%arg0: i32) -> (i32, i32) {
    %c0_i32 = arith.constant 0 : i32
    %c0_i32_0 = arith.constant 0 : i32
    %c0_i32_1 = arith.constant 0 : i32
    return %c0_i32, %c0_i32_0 : i32, i32
  }
  func.func @transform_8(%arg0: i32) -> (i32, i32) {
    %c0_i32 = arith.constant 0 : i32
    %c0_i32_0 = arith.constant 0 : i32
    %c0_i32_1 = arith.constant 0 : i32
    return %c0_i32, %c0_i32_0 : i32, i32
  }
  func.func @transform_9(%arg0: i32) -> (i32, i32, i32, i32) {
    %c0_i32 = arith.constant 0 : i32
    %c0_i32_0 = arith.constant 0 : i32
    %c0_i32_1 = arith.constant 0 : i32
    %c0_i32_2 = arith.constant 0 : i32
    return %arg0, %c0_i32, %c0_i32_0, %c0_i32_1 : i32, i32, i32, i32
  }
}

</mosaic_0001>

<bundles_post_ra>
// kernel: tpu_custom_call.1
= control target key start
LH: loop header
LB: loop body
LE: loop exit
PB: predicated region body
PF: predicated region fallthrough
CT: control target
= control target key end

     0   :  { %s5304_s0 = inlined_call_operand.hbm [shape: bf16[2,432,128], index: 0, kind: input, shape index: {}]   ;;  %s5305_s1 = inlined_call_operand.hbm [shape: f32[3,3,128], index: 1, kind: input, shape index: {}]   ;;  %s5306_s2 = inlined_call_operand.vmem [shape: f32[1,128], index: 2, kind: input, shape index: {}]   ;;  %s5307_s3 = inlined_call_operand.hbm [shape: bf16[128,128], index: 3, kind: input, shape index: {}]   ;;  %s5308_s4 = inlined_call_operand.vmem [shape: f32[1,128], index: 4, kind: input, shape index: {}]   ;;  %s5309_s5 = inlined_call_operand.hbm [shape: bf16[128,128], index: 5, kind: input, shape index: {}]   ;;  %s5310_s6 = inlined_call_operand.vmem [shape: f32[1,128], index: 6, kind: input, shape index: {}]   ;;  %s5311_s7 = inlined_call_operand.hbm [shape: bf16[128,128], index: 7, kind: input, shape index: {}]   ;;  %s5312_s8 = inlined_call_operand.vmem [shape: f32[1,128], index: 8, kind: input, shape index: {}]   ;;  %s5313_s9 = inlined_call_operand.hbm [shape: bf16[2,16,16,128], index: 9, kind: output, shape index: {}]  }
   0x1   :  { %5367 = sst [smem:[#allocation39_spill]] %s5313_s9 }
   0x2   :  { %14 = vsyncpa [#allocation5], 0 }
   0x3   :  { %16 = vsyncpa [#allocation5 + $0x1], 0 }
   0x4   :  { %17 = vsyncpa [#allocation8], 0 }
   0x5   :  { %18 = vsyncpa [#allocation11], 0 }
   0x6   :  { %19 = vsyncpa [#allocation6], 0 }
   0x7   :  { %21 = vsyncpa [#allocation6 + $0x1], 0  ;;  %s3590_s30 = smov 0   ;;  %s3592_s10 = smov 0  }
   0x8   :  { %s3594_s11 = smov 0   ;;  %s3596_s12 = smov 0  }
   0x9 LB: > { %5368 = sst [smem:[#allocation18_spill]] %s3509_s30  ;;  %s3611_s13 = sadd.s32 4294967295, %s3521_s12   ;;  %s3521_s12 = sphi %s3596_s12, %s5510_s12   ;;  %s3517_s11 = sphi %s3594_s11, %s5509_s11   ;;  %s3513_s10 = sphi %s3592_s10, %s5508_s10   ;;  %s3509_s30 = sphi %s3590_s30, %s5507_s30  }
   0xa   : > { %s2313_s14 = sadd.s32 4294967294, %s3521_s12   ;;  %p47_p0 = scmp.ne.s32.totalorder %s3513_s10, %s3509_s30 }
   0xb   : > { %p5314_p1 = scmp.eq.s32.totalorder %s3611_s13, 0  ;;  %p245_p3 = scmp.eq.s32.totalorder %s2313_s14, 1 }
   0xc   : > { %p2314_p5 = scmp.ge.s32.totalorder %s3521_s12, 1  ;;  %p252_p7 = scmp.lt.s32.totalorder %s3521_s12, 3 }
   0xd   : > { %p3620_p4 = por %p5314_p1, %p47_p0  ;;  %p3625_p6 = por %p245_p3, %p47_p0 }
   0xe   : > { %p3630_p8 = pnand %p2314_p5, %p252_p7  ;;  %s3527_s18 = smov [#allocation7]  }
   0xf   : > { %s5369_s15 = scalar_select %p3620_p4, 1, 0 }
  0x10   : > { %s5370_s16 = scalar_select %p3625_p6, 1, 0 }
  0x11   : > { %s5372_s17 = scalar_select %p3630_p8, 1, 0 }
  0x12   : > { %5371 = sst [smem:[#allocation19_spill]] %s5370_s16  ;;  %s264_s19 = sshll.u32 %s3527_s18, 4  ;;  %s3634_s19 = int_to_ptr.vmem [resolvable:$true] %s264_s19 }
  0x13   : > { %p3215_p9 = pneg %p3630_p8  ;;  %s3528_s21 = smov [#allocation10]  }
  0x14   : > { %s296_s22 = sshll.u32 %s3528_s21, 4  ;;  %s3529_s23 = smov [#allocation9]   ;;  %s3645_s22 = int_to_ptr.vmem [resolvable:$true] %s296_s22 }
  0x15   : > { %p3641_p11 = pnand %p3215_p9, %p5314_p1  ;;  %s3647_s24 = sshll.u32 %s3529_s23, 4  ;;  %s281_s24 = int_to_ptr.vmem [resolvable:$true] %s3647_s24 }
  0x16   : > { %s3301_s27 = scalar_lea.hbm %s5305_s1, 192 }
  0x17   : > { %p3302_p12 = scmp.ne.s32.totalorder %s5305_s1, %s3301_s27  ;;  %p3657_p13 = pneg %p3641_p11 }
  0x18   : > { %p3308_p5 = scmp.lt.u32.totalorder %s3301_s27, %s5305_s1 }
  0x19   : > { %p3304_p0 = pnand %p3657_p13, %p3302_p12 }
  0x1b   : > { %p3305_p3 = pneg %p3304_p0 }
  0x1d   : > { %p3310_p7 = pnand %p3308_p5, %p3305_p3 }
  0x1f   : > { %3313 = shalt.err (!%p3310_p7)
}
  0x20   : > { %s3314_s23 = scalar_lea.vmem %s3634_s19, 192  ;;  %p3322_p2 = scmp.lt.s32.totalorder %s3634_s19, %s3634_s19 }
  0x21   : > { %p3315_p9 = scmp.ne.s32.totalorder %s3634_s19, %s3314_s23  ;;  %p3323_p6 = scmp.lt.s32.totalorder %s3314_s23, %s3314_s23 }
  0x23   : > { %p3317_p10 = pnand %p3315_p9, %p3657_p13  ;;  %p3324_p12 = por %p3323_p6, %p3322_p2 }
  0x25   : > { %p3318_p1 = pneg %p3317_p10 }
  0x27   : > { %p3325_p0 = pnand %p3324_p12, %p3318_p1 }
  0x29   : > { %3328 = shalt.err (!%p3325_p0)
}
  0x2a   : > { %s5320_s25 = smov 64   ;;  %s5321_s26 = smov 4  }
  0x2b   : > { %3218 = dma.hbm_to_vmem [thread:$0]  (!%p3641_p11), %s5305_s1, 192, %s3634_s19, [#allocation8], %s5320_s25, %s5320_s25, %s5321_s26  }
  0x2c   : > { %s3329_s21 = scalar_lea.hbm %s5309_s5, 1024 }
  0x2d   : > { %p3330_p1 = scmp.ne.s32.totalorder %s5309_s5, %s3329_s21  ;;  %p3336_p10 = scmp.lt.u32.totalorder %s3329_s21, %s5309_s5 }
  0x2f   : > { %p3332_p2 = pnand %p3330_p1, %p3657_p13 }
  0x31   : > { %p3333_p6 = pneg %p3332_p2 }
  0x33   : > { %p3338_p3 = pnand %p3336_p10, %p3333_p6 }
  0x35   : > { %3341 = shalt.err (!%p3338_p3)
}
  0x36   : > { %s3342_s19 = scalar_lea.vmem %s3645_s22, 1024  ;;  %p3350_p12 = scmp.lt.s32.totalorder %s3645_s22, %s3645_s22 }
  0x37   : > { %p3343_p5 = scmp.ne.s32.totalorder %s3645_s22, %s3342_s19  ;;  %p3351_p0 = scmp.lt.s32.totalorder %s3342_s19, %s3342_s19 }
  0x39   : > { %p3345_p7 = pnand %p3343_p5, %p3657_p13  ;;  %p3352_p1 = por %p3351_p0, %p3350_p12 }
  0x3b   : > { %p3346_p9 = pneg %p3345_p7 }
  0x3d   : > { %p3353_p2 = pnand %p3352_p1, %p3346_p9 }
  0x3f   : > { %3356 = shalt.err (!%p3353_p2)
}
  0x40   : > { %3224 = dma.hbm_to_vmem [thread:$0]  (!%p3641_p11), %s5309_s5, 1024, %s3645_s22, [#allocation11], %s5320_s25, %s5320_s25, %s5321_s26  }
  0x41   : > { %s3357_s28 = scalar_lea.hbm %s5307_s3, 1024 }
  0x42   : > { %p3358_p6 = scmp.ne.s32.totalorder %s5307_s3, %s3357_s28  ;;  %p3364_p5 = scmp.lt.u32.totalorder %s3357_s28, %s5307_s3 }
  0x44   : > { %p3360_p10 = pnand %p3358_p6, %p3657_p13 }
  0x46   : > { %p3361_p3 = pneg %p3360_p10 }
  0x48   : > { %p3366_p7 = pnand %p3364_p5, %p3361_p3 }
  0x4a   : > { %3369 = shalt.err (!%p3366_p7)
}
  0x4b   : > { %s3370_s19 = scalar_lea.vmem %s281_s24, 1024  ;;  %p3378_p1 = scmp.lt.s32.totalorder %s281_s24, %s281_s24 }
  0x4c   : > { %p3371_p9 = scmp.ne.s32.totalorder %s281_s24, %s3370_s19  ;;  %p3379_p2 = scmp.lt.s32.totalorder %s3370_s19, %s3370_s19 }
  0x4e   : > { %p3373_p12 = pnand %p3371_p9, %p3657_p13  ;;  %p3380_p4 = por %p3379_p2, %p3378_p1 }
  0x50   : > { %p3374_p0 = pneg %p3373_p12 }
  0x52   : > { %p3381_p8 = pnand %p3380_p4, %p3374_p0 }
  0x54   : > { %3384 = shalt.err (!%p3381_p8)
}
  0x55   : > { %3221 = dma.hbm_to_vmem [thread:$0]  (!%p3641_p11), %s5307_s3, 1024, %s281_s24, [#allocation8], %s5320_s25, %s5320_s25, %s5321_s26  }
  0x56   : > { %s3532_s30 = smov [#allocation12]   ;;  %s3385_s29 = scalar_lea.hbm %s5311_s7, 1024 }
  0x57   : > { %s312_s16 = sshll.u32 %s3532_s30, 4  ;;  %p3386_p4 = scmp.ne.s32.totalorder %s5311_s7, %s3385_s29  ;;  %s313_s16 = int_to_ptr.vmem [resolvable:$true] %s312_s16 }
  0x58   : > { %p3392_p10 = scmp.lt.u32.totalorder %s3385_s29, %s5311_s7 }
  0x59   : > { %p3388_p8 = pnand %p3386_p4, %p3657_p13 }
  0x5b   : > { %p3389_p6 = pneg %p3388_p8 }
  0x5d   : > { %p3394_p3 = pnand %p3392_p10, %p3389_p6 }
  0x5f   : > { %3397 = shalt.err (!%p3394_p3)
}
  0x60   : > { %s3398_s24 = scalar_lea.vmem %s313_s16, 1024  ;;  %p3406_p12 = scmp.lt.s32.totalorder %s313_s16, %s313_s16 }
  0x61   : > { %p3399_p5 = scmp.ne.s32.totalorder %s313_s16, %s3398_s24  ;;  %p3407_p0 = scmp.lt.s32.totalorder %s3398_s24, %s3398_s24 }
  0x63   : > { %p3401_p7 = pnand %p3399_p5, %p3657_p13  ;;  %p3408_p1 = por %p3407_p0, %p3406_p12 }
  0x65   : > { %p3402_p9 = pneg %p3401_p7 }
  0x67   : > { %p3409_p2 = pnand %p3408_p1, %p3402_p9 }
  0x69   : > { %3412 = shalt.err (!%p3409_p2)
}
  0x6a   : > { %3227 = dma.hbm_to_vmem [thread:$0]  (!%p3641_p11), %s5311_s7, 1024, %s313_s16, [#allocation11], %s5320_s25, %s5320_s25, %s5321_s26  }
  0x6b   : > { %s3751_s14 = sadd.s32 1, %s3521_s12   ;;  %s34_s20 = sadd.s32 1, %s3517_s11 }
  0x6c   : > { %s31_s30 = ssub.s32 %s3521_s12, %s3751_s14  ;;  %p41_p13 = scmp.ne.s32.totalorder %s3517_s11, %s3513_s10 }
  0x6d   : > { %p32_p4 = scmp.eq.s32.totalorder %s31_s30, 0  ;;  %p42_p8 = scmp.eq.s32.totalorder %s3521_s12, 0 }
  0x6e   : > { %p5375_p6 = scmp.eq.s32.totalorder %s3611_s13, 1  ;;  %p3240_p3 = scmp.lt.s32.totalorder %s3521_s12, 2 }
  0x6f   : > { %s3767_s28 = scalar_select %p32_p4, %s3517_s11, %s34_s20  }
  0x70   : > { %p3761_p10 = por %p5375_p6, %p41_p13  ;;  %p43_p5 = por %p42_p8, %p41_p13 }
  0x71   : > { %s329_s29 = sand.u32 1, %s3517_s11   ;;  %s3193_s16 = smul.u32 3456, %s3521_s12 }
  0x72   : > { %s3192_s18 = smul.u32 216, %s329_s29  ;;  %p3771_p11 = pnand %p3240_p3, %p43_p5 }
  0x73   : > { %s3778_s24 = scalar_lea.hbm %s5304_s0, %s3193_s16  ;;  %s3782_s20 = scalar_lea.sflag [#allocation5], %s329_s29 }
  0x74   : > { %s333_s22 = scalar_lea.vmem [#allocation4], %s3192_s18  ;;  %s3413_s30 = scalar_lea.hbm %s3778_s24, 3456 }
  0x75   : > { %s340_s9 = sshll.u32 %s333_s22, 4  ;;  %p3414_p7 = scmp.ne.s32.totalorder %s3778_s24, %s3413_s30  ;;  %s3780_s9 = int_to_ptr.vmem [resolvable:$true] %s340_s9 }
  0x76   : > { %p3415_p9 = pneg %p3771_p11  ;;  %s3418_s19 = scalar_lea.hbm %s5304_s0, 6912 }
  0x77   : > { %p3419_p1 = scmp.lt.u32.totalorder %s3778_s24, %s5304_s0  ;;  %p3420_p2 = scmp.lt.u32.totalorder %s3418_s19, %s3413_s30 }
  0x78   : > { %p3416_p12 = pnand %p3415_p9, %p3414_p7  ;;  %p3422_p4 = scmp.lt.u32.totalorder %s3413_s30, %s3778_s24 }
  0x79   : > { %p3421_p13 = por %p3420_p2, %p3419_p1 }
  0x7a   : > { %p3417_p0 = pneg %p3416_p12 }
  0x7b   : > { %p3423_p8 = por %p3422_p4, %p3421_p13 }
  0x7d   : > { %p3424_p6 = pnand %p3423_p8, %p3417_p0 }
  0x7f   : > { %3427 = shalt.err (!%p3424_p6)
}
  0x80   : > { %s3428_s29 = scalar_lea.vmem %s3780_s9, 3456  ;;  %s3533_s18 = smov [#allocation4]  }
  0x81   : > { %p3429_p3 = scmp.ne.s32.totalorder %s3780_s9, %s3428_s29  ;;  %s3433_s22 = sshll.u32 %s3533_s18, 4  ;;  %s3434_s22 = int_to_ptr.vmem [resolvable:$false] %s3433_s22 }
  0x82   : > { %s3435_s25 = scalar_lea.vmem %s3434_s22, 6912  ;;  %p3436_p12 = scmp.lt.s32.totalorder %s3780_s9, %s3434_s22 }
  0x83   : > { %p3431_p5 = pnand %p3429_p3, %p3415_p9  ;;  %p3437_p1 = scmp.lt.s32.totalorder %s3435_s25, %s3428_s29 }
  0x85   : > { %p3432_p7 = pneg %p3431_p5  ;;  %p3438_p2 = por %p3437_p1, %p3436_p12 }
  0x87   : > { %p3439_p13 = pnand %p3438_p2, %p3432_p7 }
  0x89   : > { %3442 = shalt.err (!%p3439_p13)
}
  0x8a   : > { %s5378_s26 = smov 4   ;;  %s5379_s30 = smov 64  }
  0x8b   : > { %3231 = dma.hbm_to_vmem [thread:$0]  (!%p3771_p11), %s3778_s24, 3456, %s3780_s9, %s3782_s20, %s5379_s30, %s5379_s30, %s5378_s26  }
  0x8c   : > { %p5380_p9 = scmp.ne.s32.totalorder %s5372_s17, 0 }
  0x8e   : > { %352 = sbr.rel (%p5380_p9) target bundleno = 1295 (0x50f), region = 56 }
  0x95   : > { %s3816_s16 = sand.u32 1, %s3513_s10   ;;  %p5381_p0 = scmp.ne.s32.totalorder %s5369_s15, 0 }
  0x96   : > { %s3194_s23 = smul.u32 216, %s3816_s16  ;;  %s355_s19 = scalar_lea.sflag [#allocation5], %s3816_s16 }
  0x98   : > { %s3820_s29 = scalar_lea.vmem [#allocation4], %s3194_s23 }
  0x99   : > { %3492 = dma.done.wait (%p5381_p0), %s355_s19, 3456  }
  0x9a   : > { %3494 = vsyncadd (%p5381_p0), %s355_s19, 4294963840  ;;  %p5382_p11 = scmp.eq.s32.totalorder %s3611_s13, 0 }
  0x9c   : > { %3496 = dma.done.wait (%p5382_p11), [#allocation8], 1216   ;;  %p5383_p4 = pmov %p5382_p11 }
  0x9e   : > { %3498 = vsyncadd (%p5383_p4), [#allocation8], 4294966080  ;;  %p5384_p8 = pmov %p5383_p4 }
  0x9f   : > { %p5385_p6 = pmov %p5383_p4 }
  0xa0   : > { %3500 = dma.done.wait (%p5384_p8), [#allocation11], 2048  }
  0xa1   : > { %3502 = vsyncadd (%p5385_p6), [#allocation11], 4294965248  ;;  %s2326_s17 = sshll.u32 %s3816_s16, 7  ;;  %v5322_v0 = vmov 0.0   ;;  %v3839_v1 = vld [vmem:[%s5306_s2] ss:$0 sm:$0xff] }
  0xa2   : > { %410 = vst [vmem:[#allocation3] sm:$0x1] %v5322_v0  ;;  %5386 = vst [vmem:[#allocation20_spill] sm:$0xff] %v3839_v1  ;;  %v3841_v2 = vld [vmem:[#allocation7] ss:$0 sm:$0xff]  ;;  %s3859_s24 = scalar_lea.vmem [#allocation13], %s2326_s17 }
  0xa3   : > { %5387 = vst [vmem:[#allocation21_spill] sm:$0xff] %v3841_v2  ;;  %v3843_v3 = vld [vmem:[#allocation7 + $0x1] ss:$0 sm:$0xff]  ;;  %v3845_v4 = vld [vmem:[#allocation7 + $0x2] ss:$0 sm:$0xff]  ;;  %s3861_s9 = smov 0  }
  0xa4   : > { %5388 = vst [vmem:[#allocation22_spill] sm:$0xff] %v3843_v3  ;;  %5389 = vst [vmem:[#allocation23_spill] sm:$0xff] %v3845_v4  ;;  %v3847_v5 = vld [vmem:[#allocation7 + $0x4] ss:$0 sm:$0xff]  ;;  %v3849_v6 = vld [vmem:[#allocation7 + $0x5] ss:$0 sm:$0xff] }
  0xa5   : > { %5390 = vst [vmem:[#allocation24_spill] sm:$0xff] %v3847_v5  ;;  %5391 = vst [vmem:[#allocation25_spill] sm:$0xff] %v3849_v6  ;;  %v3851_v7 = vld [vmem:[#allocation7 + $0x6] ss:$0 sm:$0xff]  ;;  %v3853_v8 = vld [vmem:[#allocation7 + $0x8] ss:$0 sm:$0xff] }
  0xa6   : > { %5392 = vst [vmem:[#allocation26_spill] sm:$0xff] %v3851_v7  ;;  %5393 = vst [vmem:[#allocation27_spill] sm:$0xff] %v3853_v8  ;;  %v3855_v9 = vld [vmem:[#allocation7 + $0x9] ss:$0 sm:$0xff]  ;;  %v3857_v10 = vld [vmem:[#allocation7 + $0xa] ss:$0 sm:$0xff] }
  0xa7   : > { %5394 = vst [vmem:[#allocation28_spill] sm:$0xff] %v3855_v9  ;;  %5395 = vst [vmem:[#allocation29_spill] sm:$0xff] %v3857_v10 }
  0xa8 LB: >> { %s2328_s20 = smul.u32 192, %s3525_s9  ;;  %v543_v11 = vlaneseq  ;;  %s2327_s26 = sshll.u32 %s3525_s9, 3  ;;  %s3525_s9 = sphi %s3861_s9, %s428_s9  }
  0xa9   : >> { %s4131_s30 = sadd.s32 1, %s2327_s26  ;;  %s4551_s15 = sadd.s32 2, %s2327_s26 }
  0xaa   : >> { %v5397_v2 = vld [vmem:[#allocation21_spill] sm:$0xff]  ;;  %s431_s18 = sshra.s32 %s2328_s20, 3  ;;  %v3872_v15 = vshrl.u32 %v543_v11, 7  ;;  %s676_s23 = smul.u32 24, %s4131_s30 }
  0xab   : >> { %v5396_v3 = vld [vmem:[#allocation22_spill] sm:$0xff]  ;;  %s2329_s22 = sshll.u32 %s431_s18, 2  ;;  %s918_s20 = smul.u32 24, %s4551_s15 }
  0xac   : >> { %s434_s25 = scalar_lea.vmem %s3820_s29, %s2329_s22 [#allocation4]  ;;  %vm545_vm0 = vcmp.lt.s32.totalorder %v3872_v15, 7  ;;  %vm622_vm1 = vcmp.lt.s32.totalorder %v3872_v15, 6  ;;  %s677_s19 = sshra.s32 %s676_s23, 3 }
  0xad   : >> { %v2465_v12 = vld [vmem:[%s434_s25] sm:$0xff]   ;;  %v3868_v13 = vld [vmem:[%s434_s25 + $0x8] sm:$0xff]   ;;  %v3870_v14 = vld [vmem:[%s434_s25 + $0x10] sm:$0xff]   ;;  %s2333_s17 = sshll.u32 %s677_s19, 2  ;;  %s919_s18 = sshra.s32 %s918_s20, 3 }
  0xae   : >> { %v3874_v16 = vunpack.c.l.bf16 %v2465_v12  ;;  %v3876_v17 = vunpack.c.h.bf16 %v2465_v12  ;;  %v5325_v18 = vunpack.c.l.bf16 %v3868_v13  ;;  %v3880_v19 = vunpack.c.h.bf16 %v3868_v13  ;;  %v2878_v20 = vld [vmem:[%s434_s25 + $0x18] sm:$0xff]   ;;  %v3882_v21 = vld [vmem:[%s434_s25 + $0x20] sm:$0xff]   ;;  %v3884_v22 = vld [vmem:[%s434_s25 + $0x28] sm:$0xff]   ;;  %s4211_s21 = scalar_lea.vmem %s3820_s29, %s2333_s17 [#allocation4]  ;;  %s2337_s22 = sshll.u32 %s919_s18, 2 }
  0xaf   : >> { %5398 = vst [vmem:[#allocation30_spill] sm:$0xff] %v3884_v22  ;;  %v3887_v23 = vunpack.c.l.bf16 %v3870_v14  ;;  %v5329_v24 = vunpack.c.h.bf16 %v3870_v14  ;;  %v3890_v25 = vunpack.c.l.bf16 %v2878_v20  ;;  %v3892_v26 = vunpack.c.h.bf16 %v2878_v20  ;;  %v2881_v27 = vld [vmem:[%s434_s25 + $0x30] sm:$0xff]   ;;  %v3894_v28 = vld [vmem:[%s434_s25 + $0x38] sm:$0xff]   ;;  %v3896_v29 = vld [vmem:[%s434_s25 + $0x40] sm:$0xff]   ;;  %s2430_s26 = sshll.u32 %s3525_s9, 6  ;;  %s428_s9 = sadd.s32 1, %s3525_s9  }
  0xb0   : >> { %5399 = vst [vmem:[#allocation31_spill] sm:$0xff] %v3894_v28  ;;  %v5333_v30 = vunpack.c.l.bf16 %v3882_v21  ;;  %v3900_v31 = vunpack.c.h.bf16 %v3882_v21  ;;  %v3903_v32 = vunpack.c.l.bf16 %v3884_v22  ;;  %v2884_v34 = vld [vmem:[%s434_s25 + $0x48] sm:$0xff]   ;;  %v3906_v35 = vld [vmem:[%s434_s25 + $0x50] sm:$0xff]   ;;  %v3908_v36 = vld [vmem:[%s434_s25 + $0x58] sm:$0xff]   ;;  %v3910_v37 = vunpack.c.l.bf16 %v2881_v27  ;;  %s4631_s25 = scalar_lea.vmem %s3820_s29, %s2337_s22 [#allocation4]  ;;  %s1206_s30 = scalar_lea.vmem [#allocation2], %s2430_s26 }
  0xb1   : >> { %5401 = vst [vmem:[#allocation33_spill] sm:$0xff] %v3906_v35  ;;  %v3912_v38 = vunpack.c.h.bf16 %v2881_v27  ;;  %v3916_v40 = vunpack.c.h.bf16 %v3894_v28  ;;  %v3919_v41 = vunpack.c.l.bf16 %v3896_v29  ;;  %v3922_v43 = vunpack.c.l.bf16 %v2884_v34  ;;  %p425_p3 = scmp.ge.s32.totalorder %s428_s9, 2  }
  0xb2   : >> { %5400 = vst [vmem:[#allocation32_spill] sm:$0xff] %v3903_v32  ;;  %5402 = vst [vmem:[#allocation34_spill] sm:$0xff] %v3910_v37  ;;  %v3924_v44 = vunpack.c.h.bf16 %v2884_v34  ;;  %v3928_v46 = vunpack.c.h.bf16 %v3906_v35  ;;  %v3931_v47 = vunpack.c.l.bf16 %v3908_v36  ;;  %v3936_v49 = vmul.f32 %v3874_v16, %v5397_v2  ;;  %s2187_s20 = sshll.u32 (%p425_p3), %s3859_s24, 4  ;;  %s3537_s9 = smov (%p425_p3), [#allocation13]   ;;  %s5258_s20 = int_to_ptr.vmem [resolvable:$true] %s2187_s20 }
  0xb3   : >> { %5403 = vst [vmem:[#allocation35_spill] sm:$0xff] %v3912_v38  ;;  %5404 = vst [vmem:[#allocation36_spill] sm:$0xff] %v3919_v41  ;;  %v3940_v50 = vmul.f32 %v3876_v17, %v5397_v2  ;;  %v3944_v51 = vmul.f32 %v3880_v19, %v5397_v2  ;;  %v3948_v52 = vmul.f32 %v3887_v23, %v5397_v2  ;;  %v519_v12 = vrot.slane %v3874_v16, 1  ;;  %s3447_s23 = sshll.u32 (%p425_p3), %s3537_s9, 4  ;;  %s3448_s23 = int_to_ptr.vmem [resolvable:$false] %s3447_s23 }
  0xb4   : >> { %5405 = vst [vmem:[#allocation37_spill] sm:$0xff] %v3922_v43  ;;  %5406 = vst [vmem:[#allocation38_spill] sm:$0xff] %v3931_v47  ;;  %v3952_v53 = vmul.f32 %v3890_v25, %v5397_v2  ;;  %v3956_v54 = vmul.f32 %v3892_v26, %v5397_v2  ;;  %v3960_v55 = vmul.f32 %v3900_v31, %v5397_v2  ;;  %v520_v20 = vrot.slane %v3876_v17, 1  ;;  %s3449_s19 = scalar_lea.vmem (%p425_p3), %s3448_s23, 4096  ;;  %p3450_p1 = scmp.lt.s32.totalorder (%p425_p3), %s5258_s20, %s3448_s23 }
  0xb5   : >> { %v3964_v56 = vmul.f32 %v3903_v32, %v5397_v2  ;;  %v3969_v57 = vmul.f32 %v3910_v37, %v5397_v2  ;;  %v3973_v58 = vmul.f32 %v3912_v38, %v5397_v2  ;;  %v3977_v59 = vmul.f32 %v3916_v40, %v5397_v2 }
  0xb6   : >> { %v3981_v60 = vmul.f32 %v3919_v41, %v5397_v2  ;;  %v3985_v61 = vmul.f32 %v3922_v43, %v5397_v2  ;;  %v3989_v62 = vmul.f32 %v3924_v44, %v5397_v2  ;;  %v3993_v63 = vmul.f32 %v3928_v46, %v5397_v2 }
  0xb7   : >> { %v3997_v11 = vmul.f32 %v3931_v47, %v5397_v2  ;;  %v521_v27 = vrot.slane %v5325_v18, 1  ;;  %v522_v34 = vrot.slane %v3880_v19, 1  ;;  %v523_v0 = vrot.slane %v3887_v23, 1 }
  0xb8   : >> { %v524_v48 = vrot.slane %v5329_v24, 1  ;;  %v525_v45 = vrot.slane %v3890_v25, 1  ;;  %v526_v42 = vrot.slane %v3892_v26, 1  ;;  %v527_v39 = vrot.slane %v5333_v30, 1 }
  0xb9   : >> { %v528_v33 = vrot.slane %v3900_v31, 1  ;;  %v529_v2 = vrot.slane %v3903_v32, 1  ;;  %v5407_v18 = vunpack.c.h.bf16 %v3884_v22  ;;  %v531_v10 = vrot.slane %v3910_v37, 1 }
  0xba   : >> { %v532_v9 = vrot.slane %v3912_v38, 1  ;;  %v5408_v24 = vunpack.c.l.bf16 %v3894_v28  ;;  %v534_v7 = vrot.slane %v3916_v40, 1  ;;  %v535_v6 = vrot.slane %v3919_v41, 1 }
  0xbb   : >> { %v530_v1 = vrot.slane %v5407_v18, 1  ;;  %v5409_v30 = vunpack.c.h.bf16 %v3896_v29  ;;  %v537_v4 = vrot.slane %v3922_v43, 1  ;;  %v538_v32 = vrot.slane %v3924_v44, 1 }
  0xbc   : >> { %v533_v8 = vrot.slane %v5408_v24, 1  ;;  %v5410_v18 = vunpack.c.l.bf16 %v3906_v35  ;;  %v540_v37 = vrot.slane %v3928_v46, 1  ;;  %v541_v38 = vrot.slane %v3931_v47, 1 }
  0xbd   : >> { %v536_v5 = vrot.slane %v5409_v30, 1  ;;  %v5411_v24 = vunpack.c.h.bf16 %v3908_v36  ;;  %v549_v41 = vsel %vm545_vm0, %v537_v4, %v538_v32  ;;  %v551_v43 = vsel %vm545_vm0, %v534_v7, %v535_v6 }
  0xbe   : >> { %v539_v22 = vrot.slane %v5410_v18, 1  ;;  %v552_v35 = vsel %vm545_vm0, %v532_v9, %v533_v8  ;;  %v547_v47 = vsel %vm545_vm0, %v540_v37, %v541_v38  ;;  %v553_v4 = vsel %vm545_vm0, %v531_v10, %v532_v9 }
  0xbf   : >> { %v542_v28 = vrot.slane %v5411_v24, 1  ;;  %v550_v30 = vsel %vm545_vm0, %v535_v6, %v536_v5  ;;  %v554_v5 = vsel %vm545_vm0, %v529_v2, %v530_v1  ;;  %v555_v6 = vsel %vm545_vm0, %v528_v33, %v529_v2 }
  0xc0   : >> { %v548_v24 = vsel %vm545_vm0, %v538_v32, %v539_v22  ;;  %v556_v7 = vsel %vm545_vm0, %v526_v42, %v527_v39  ;;  %v557_v8 = vsel %vm545_vm0, %v525_v45, %v526_v42  ;;  %v559_v22 = vsel %vm545_vm0, %v522_v34, %v523_v0 }
  0xc1   : >> { %v546_v18 = vsel %vm545_vm0, %v541_v38, %v542_v28  ;;  %v558_v28 = vsel %vm545_vm0, %v523_v0, %v524_v48  ;;  %v560_v9 = vsel %vm545_vm0, %v520_v20, %v521_v27  ;;  %v561_v1 = vsel %vm545_vm0, %v519_v12, %v520_v20 }
  0xc2   : >> { %v566_v2 = vmul.f32 %v5396_v3, %v561_v1  ;;  %v567_v10 = vmul.f32 %v5396_v3, %v560_v9  ;;  %v568_v32 = vmul.f32 %v5396_v3, %v559_v22  ;;  %v569_v33 = vmul.f32 %v5396_v3, %v558_v28 }
  0xc3   : >> { %v570_v37 = vmul.f32 %v5396_v3, %v557_v8  ;;  %v571_v38 = vmul.f32 %v5396_v3, %v556_v7  ;;  %v572_v0 = vmul.f32 %v5396_v3, %v555_v6  ;;  %v573_v39 = vmul.f32 %v5396_v3, %v554_v5 }
  0xc4   : >> { %v574_v42 = vmul.f32 %v5396_v3, %v553_v4  ;;  %v575_v45 = vmul.f32 %v5396_v3, %v552_v35  ;;  %v576_v48 = vmul.f32 %v5396_v3, %v551_v43  ;;  %v577_v12 = vmul.f32 %v5396_v3, %v550_v30 }
  0xc5   : >> { %v578_v20 = vmul.f32 %v5396_v3, %v549_v41  ;;  %v579_v27 = vmul.f32 %v5396_v3, %v548_v24  ;;  %v580_v34 = vmul.f32 %v5396_v3, %v547_v47  ;;  %v581_v7 = vmul.f32 %v5396_v3, %v546_v18 }
  0xc6   : >> { %v4081_v6 = vadd.f32 %v566_v2, %v3936_v49  ;;  %v4084_v4 = vadd.f32 %v567_v10, %v3940_v50  ;;  %v4087_v35 = vadd.f32 %v568_v32, %v3944_v51  ;;  %v4090_v43 = vadd.f32 %v569_v33, %v3948_v52  ;;  %v5419_v2 = vld [vmem:[#allocation35_spill] sm:$0xff]  ;;  %v5422_v33 = vld [vmem:[#allocation36_spill] sm:$0xff] }
  0xc7   : >> { %v4093_v41 = vadd.f32 %v570_v37, %v3952_v53  ;;  %v4096_v47 = vadd.f32 %v571_v38, %v3956_v54  ;;  %v4099_v30 = vadd.f32 %v572_v0, %v3960_v55  ;;  %v4102_v49 = vadd.f32 %v573_v39, %v3964_v56  ;;  %v5420_v10 = vld [vmem:[#allocation31_spill] sm:$0xff]  ;;  %v5424_v38 = vld [vmem:[#allocation37_spill] sm:$0xff] }
  0xc8   : >> { %v4106_v50 = vadd.f32 %v574_v42, %v3969_v57  ;;  %v4109_v51 = vadd.f32 %v575_v45, %v3973_v58  ;;  %v4112_v52 = vadd.f32 %v576_v48, %v3977_v59  ;;  %v4115_v53 = vadd.f32 %v577_v12, %v3981_v60  ;;  %v5425_v42 = vld [vmem:[#allocation33_spill] sm:$0xff] }
  0xc9   : >> { %v4118_v54 = vadd.f32 %v578_v20, %v3985_v61  ;;  %v4121_v55 = vadd.f32 %v579_v27, %v3989_v62  ;;  %v4124_v56 = vadd.f32 %v580_v34, %v3993_v63  ;;  %v4127_v57 = vadd.f32 %v581_v7, %v3997_v11  ;;  %v5427_v20 = vld [vmem:[#allocation38_spill] sm:$0xff] }
  0xca   : >> { %v598_v58 = vrot.slane %v3874_v16, 2  ;;  %v599_v59 = vrot.slane %v3876_v17, 2  ;;  %v5412_v60 = vunpack.c.l.bf16 %v3868_v13  ;;  %v601_v62 = vrot.slane %v3880_v19, 2  ;;  %v5415_v17 = vld [vmem:[#allocation32_spill] sm:$0xff]  ;;  %v5416_v13 = vld [vmem:[#allocation30_spill] sm:$0xff] }
  0xcb   : >> { %v602_v18 = vrot.slane %v3887_v23, 2  ;;  %v5413_v63 = vunpack.c.h.bf16 %v3870_v14  ;;  %v604_v11 = vrot.slane %v3890_v25, 2  ;;  %v605_v5 = vrot.slane %v3892_v26, 2  ;;  %v5418_v19 = vld [vmem:[#allocation34_spill] sm:$0xff] }
  0xcc   : >> { %v600_v61 = vrot.slane %v5412_v60, 2  ;;  %v5414_v8 = vunpack.c.l.bf16 %v3882_v21  ;;  %v607_v16 = vrot.slane %v3900_v31, 2  ;;  %v608_v22 = vrot.slane %v5415_v17, 2 }
  0xcd   : >> { %v603_v24 = vrot.slane %v5413_v63, 2  ;;  %v5417_v9 = vunpack.c.h.bf16 %v5416_v13  ;;  %v610_v23 = vrot.slane %v5418_v19, 2  ;;  %v611_v14 = vrot.slane %v5419_v2, 2 }
  0xce   : >> { %v606_v28 = vrot.slane %v5414_v8, 2  ;;  %v5421_v32 = vunpack.c.l.bf16 %v5420_v10  ;;  %v613_v26 = vrot.slane %v3916_v40, 2  ;;  %v614_v21 = vrot.slane %v5422_v33, 2 }
  0xcf   : >> { %v609_v1 = vrot.slane %v5417_v9, 2  ;;  %v5423_v37 = vunpack.c.h.bf16 %v3896_v29  ;;  %v616_v0 = vrot.slane %v5424_v38, 2  ;;  %v617_v39 = vrot.slane %v3924_v44, 2 }
  0xd0   : >> { %v612_v25 = vrot.slane %v5421_v32, 2  ;;  %v5426_v45 = vunpack.c.l.bf16 %v5425_v42  ;;  %v619_v12 = vrot.slane %v3928_v46, 2  ;;  %v620_v27 = vrot.slane %v5427_v20, 2  ;;  %v4274_v20 = vld [vmem:[%s4211_s21 + $0x20] sm:$0xff]  }
  0xd1   : >> { %v615_v31 = vrot.slane %v5423_v37, 2  ;;  %v5428_v34 = vunpack.c.h.bf16 %v3908_v36  ;;  %v626_v40 = vsel %vm622_vm1, %v616_v0, %v617_v39  ;;  %v628_v60 = vsel %vm622_vm1, %v613_v26, %v614_v21 }
  0xd2   : >> { %v618_v48 = vrot.slane %v5426_v45, 2  ;;  %v629_v44 = vsel %vm622_vm1, %v611_v14, %v612_v25  ;;  %v624_v36 = vsel %vm622_vm1, %v619_v12, %v620_v27  ;;  %v630_v8 = vsel %vm622_vm1, %v610_v23, %v611_v14  ;;  %v2513_v45 = vld [vmem:[%s4211_s21] sm:$0xff]  }
  0xd3   : >> { %v621_v7 = vrot.slane %v5428_v34, 2  ;;  %v627_v29 = vsel %vm622_vm1, %v614_v21, %v615_v31  ;;  %v631_v17 = vsel %vm622_vm1, %v608_v22, %v609_v1  ;;  %v632_v13 = vsel %vm622_vm1, %v607_v16, %v608_v22  ;;  %v5429_v16 = vld [vmem:[#allocation23_spill] sm:$0xff] }
  0xd4   : >> { %v625_v63 = vsel %vm622_vm1, %v617_v39, %v618_v48  ;;  %v633_v9 = vsel %vm622_vm1, %v605_v5, %v606_v28  ;;  %v634_v19 = vsel %vm622_vm1, %v604_v11, %v605_v5  ;;  %v635_v2 = vsel %vm622_vm1, %v602_v18, %v603_v24  ;;  %v4258_v48 = vld [vmem:[%s4211_s21 + $0x10] sm:$0xff]  }
  0xd5   : >> { %v623_v46 = vsel %vm622_vm1, %v620_v27, %v621_v7  ;;  %v636_v10 = vsel %vm622_vm1, %v601_v62, %v602_v18  ;;  %v637_v23 = vsel %vm622_vm1, %v599_v59, %v600_v61  ;;  %v638_v1 = vsel %vm622_vm1, %v598_v58, %v599_v59  ;;  %v4289_v7 = vld [vmem:[%s4211_s21 + $0x38] sm:$0xff]  }
  0xd6   : >> { %v643_v22 = vmul.f32 %v5429_v16, %v638_v1  ;;  %v644_v28 = vmul.f32 %v5429_v16, %v637_v23  ;;  %v645_v11 = vmul.f32 %v5429_v16, %v636_v10  ;;  %v646_v5 = vmul.f32 %v5429_v16, %v635_v2  ;;  %5431 = vst [vmem:[#allocation30_spill] sm:$0xff] %v4289_v7 }
  0xd7   : >> { %v647_v24 = vmul.f32 %v5429_v16, %v634_v19  ;;  %v648_v62 = vmul.f32 %v5429_v16, %v633_v9  ;;  %v649_v18 = vmul.f32 %v5429_v16, %v632_v13  ;;  %v650_v61 = vmul.f32 %v5429_v16, %v631_v17  ;;  %v4312_v13 = vld [vmem:[%s4211_s21 + $0x50] sm:$0xff]   ;;  %v4315_v9 = vld [vmem:[%s4211_s21 + $0x58] sm:$0xff]  }
  0xd8   : >> { %v651_v14 = vmul.f32 %v5429_v16, %v630_v8  ;;  %v652_v58 = vmul.f32 %v5429_v16, %v629_v44  ;;  %v653_v59 = vmul.f32 %v5429_v16, %v628_v60  ;;  %v654_v32 = vmul.f32 %v5429_v16, %v627_v29  ;;  %v4300_v44 = vld [vmem:[%s4211_s21 + $0x40] sm:$0xff]   ;;  %5432 = vst [vmem:[#allocation34_spill] sm:$0xff] %v4312_v13 }
  0xd9   : >> { %v655_v25 = vmul.f32 %v5429_v16, %v626_v40  ;;  %v656_v26 = vmul.f32 %v5429_v16, %v625_v63  ;;  %v657_v33 = vmul.f32 %v5429_v16, %v624_v36  ;;  %v658_v21 = vmul.f32 %v5429_v16, %v623_v46  ;;  %v2895_v46 = vld [vmem:[%s4211_s21 + $0x48] sm:$0xff]  }
  0xda   : >> { %v4218_v37 = vadd.f32 %v643_v22, %v4081_v6  ;;  %v4221_v31 = vadd.f32 %v644_v28, %v4084_v4  ;;  %v4224_v38 = vadd.f32 %v645_v11, %v4087_v35  ;;  %v4227_v0 = vadd.f32 %v646_v5, %v4090_v43  ;;  %v4243_v35 = vld [vmem:[%s4211_s21 + $0x8] sm:$0xff]  }
  0xdb   : >> { %v4230_v39 = vadd.f32 %v647_v24, %v4093_v41  ;;  %v4233_v42 = vadd.f32 %v648_v62, %v4096_v47  ;;  %v4236_v6 = vadd.f32 %v649_v18, %v4099_v30  ;;  %v4239_v4 = vadd.f32 %v650_v61, %v4102_v49  ;;  %v2889_v49 = vld [vmem:[%s4211_s21 + $0x18] sm:$0xff]  }
  0xdc   : >> { %v4246_v43 = vadd.f32 %v651_v14, %v4106_v50  ;;  %v4249_v41 = vadd.f32 %v652_v58, %v4109_v51  ;;  %v4252_v47 = vadd.f32 %v653_v59, %v4112_v52  ;;  %v4255_v30 = vadd.f32 %v654_v32, %v4115_v53  ;;  %v4277_v53 = vld [vmem:[%s4211_s21 + $0x28] sm:$0xff]   ;;  %v5438_v61 = vld [vmem:[#allocation24_spill] sm:$0xff] }
  0xdd   : >> { %v4262_v12 = vadd.f32 %v655_v25, %v4118_v54  ;;  %v4265_v50 = vadd.f32 %v656_v26, %v4121_v55  ;;  %v4268_v51 = vadd.f32 %v657_v33, %v4124_v56  ;;  %v4271_v52 = vadd.f32 %v658_v21, %v4127_v57  ;;  %5430 = vst [vmem:[#allocation32_spill] sm:$0xff] %v4277_v53  ;;  %v2892_v56 = vld [vmem:[%s4211_s21 + $0x30] sm:$0xff]  }
  0xde   : >> { %v4279_v27 = vunpack.c.l.bf16 %v2513_v45  ;;  %v4281_v54 = vunpack.c.h.bf16 %v2513_v45  ;;  %v4285_v34 = vunpack.c.h.bf16 %v4243_v35  ;;  %v4292_v57 = vunpack.c.l.bf16 %v4258_v48 }
  0xdf   : >> { %v4295_v29 = vunpack.c.l.bf16 %v2889_v49  ;;  %v4297_v60 = vunpack.c.h.bf16 %v2889_v49  ;;  %v4305_v63 = vunpack.c.h.bf16 %v4274_v20  ;;  %v4308_v8 = vunpack.c.l.bf16 %v4277_v53 }
  0xe0   : >> { %v4317_v19 = vunpack.c.l.bf16 %v2892_v56  ;;  %v4319_v2 = vunpack.c.h.bf16 %v2892_v56  ;;  %v4323_v23 = vunpack.c.h.bf16 %v4289_v7  ;;  %v4326_v1 = vunpack.c.l.bf16 %v4300_v44 }
  0xe1   : >> { %v4329_v28 = vunpack.c.l.bf16 %v2895_v46  ;;  %v4331_v11 = vunpack.c.h.bf16 %v2895_v46  ;;  %v4335_v24 = vunpack.c.h.bf16 %v4312_v13  ;;  %v4338_v62 = vunpack.c.l.bf16 %v4315_v9 }
  0xe2   : >> { %5433 = vst [vmem:[#allocation35_spill] sm:$0xff] %v4317_v19  ;;  %5434 = vst [vmem:[#allocation31_spill] sm:$0xff] %v4319_v2  ;;  %v733_v14 = vmul.f32 %v4279_v27, %v5438_v61  ;;  %v734_v58 = vmul.f32 %v4281_v54, %v5438_v61  ;;  %v735_v59 = vmul.f32 %v4285_v34, %v5438_v61  ;;  %vm3536_vm2 = vmmov (%p425_p3), 0  }
  0xe3   : >> { %5435 = vst [vmem:[#allocation36_spill] sm:$0xff] %v4326_v1  ;;  %5436 = vst [vmem:[#allocation37_spill] sm:$0xff] %v4329_v28  ;;  %v736_v32 = vmul.f32 %v4292_v57, %v5438_v61  ;;  %v737_v25 = vmul.f32 %v4295_v29, %v5438_v61  ;;  %v738_v26 = vmul.f32 %v4297_v60, %v5438_v61 }
  0xe4   : >> { %5437 = vst [vmem:[#allocation33_spill] sm:$0xff] %v4338_v62  ;;  %v739_v33 = vmul.f32 %v4305_v63, %v5438_v61  ;;  %v740_v21 = vmul.f32 %v4308_v8, %v5438_v61  ;;  %v741_v45 = vmul.f32 %v4317_v19, %v5438_v61  ;;  %v742_v49 = vmul.f32 %v4319_v2, %v5438_v61 }
  0xe5   : >> { %v743_v56 = vmul.f32 %v4323_v23, %v5438_v61  ;;  %v744_v46 = vmul.f32 %v4326_v1, %v5438_v61  ;;  %v745_v18 = vmul.f32 %v4329_v28, %v5438_v61  ;;  %v746_v5 = vmul.f32 %v4331_v11, %v5438_v61 }
  0xe6   : >> { %v747_v22 = vmul.f32 %v4335_v24, %v5438_v61  ;;  %v748_v10 = vmul.f32 %v4338_v62, %v5438_v61  ;;  %v4374_v17 = vadd.f32 %v733_v14, %v4218_v37  ;;  %v4377_v36 = vadd.f32 %v734_v58, %v4221_v31 }
  0xe7   : >> { %v4380_v40 = vadd.f32 %v735_v59, %v4224_v38  ;;  %v4383_v55 = vadd.f32 %v736_v32, %v4227_v0  ;;  %v4386_v3 = vadd.f32 %v737_v25, %v4230_v39  ;;  %v4389_v16 = vadd.f32 %v738_v26, %v4233_v42 }
  0xe8   : >> { %v4392_v61 = vadd.f32 %v739_v33, %v4236_v6  ;;  %v4395_v37 = vadd.f32 %v740_v21, %v4239_v4  ;;  %v4398_v31 = vadd.f32 %v741_v45, %v4246_v43  ;;  %v4401_v38 = vadd.f32 %v742_v49, %v4249_v41 }
  0xe9   : >> { %v4404_v0 = vadd.f32 %v743_v56, %v4252_v47  ;;  %v4407_v39 = vadd.f32 %v744_v46, %v4255_v30  ;;  %v4410_v42 = vadd.f32 %v745_v18, %v4262_v12  ;;  %v4413_v6 = vadd.f32 %v746_v5, %v4265_v50 }
  0xea   : >> { %v4416_v4 = vadd.f32 %v747_v22, %v4268_v51  ;;  %v4419_v43 = vadd.f32 %v748_v10, %v4271_v52  ;;  %v765_v41 = vrot.slane %v4279_v27, 1  ;;  %v766_v47 = vrot.slane %v4281_v54, 1 }
  0xeb   : >> { %v5439_v14 = vunpack.c.l.bf16 %v4243_v35  ;;  %v768_v58 = vrot.slane %v4285_v34, 1  ;;  %v769_v12 = vrot.slane %v4292_v57, 1  ;;  %v5440_v50 = vunpack.c.h.bf16 %v4258_v48 }
  0xec   : >> { %v771_v51 = vrot.slane %v4295_v29, 1  ;;  %v772_v22 = vrot.slane %v4297_v60, 1  ;;  %v5441_v52 = vunpack.c.l.bf16 %v4274_v20  ;;  %v774_v18 = vrot.slane %v4305_v63, 1 }
  0xed   : >> { %v767_v30 = vrot.slane %v5439_v14, 1  ;;  %v770_v5 = vrot.slane %v5440_v50, 1  ;;  %v775_v59 = vrot.slane %v4308_v8, 1  ;;  %v5442_v32 = vunpack.c.h.bf16 %v4277_v53 }
  0xee   : >> { %v773_v10 = vrot.slane %v5441_v52, 1  ;;  %v777_v26 = vrot.slane %v4317_v19, 1  ;;  %v778_v33 = vrot.slane %v4319_v2, 1  ;;  %v5443_v21 = vunpack.c.l.bf16 %v4289_v7 }
  0xef   : >> { %v776_v25 = vrot.slane %v5442_v32, 1  ;;  %v780_v49 = vrot.slane %v4323_v23, 1  ;;  %v781_v56 = vrot.slane %v4326_v1, 1  ;;  %v5444_v46 = vunpack.c.h.bf16 %v4300_v44 }
  0xf0   : >> { %v779_v45 = vrot.slane %v5443_v21, 1  ;;  %v783_v50 = vrot.slane %v4329_v28, 1  ;;  %v784_v52 = vrot.slane %v4331_v11, 1  ;;  %v5445_v32 = vunpack.c.l.bf16 %v4312_v13 }
  0xf1   : >> { %v782_v14 = vrot.slane %v5444_v46, 1  ;;  %v786_v19 = vrot.slane %v4335_v24, 1  ;;  %v787_v2 = vrot.slane %v4338_v62, 1  ;;  %v5446_v21 = vunpack.c.h.bf16 %v4315_v9 }
  0xf2   : >> { %v785_v53 = vrot.slane %v5445_v32, 1  ;;  %v792_v1 = vsel %vm545_vm0, %v783_v50, %v784_v52  ;;  %v794_v28 = vsel %vm545_vm0, %v780_v49, %v781_v56  ;;  %v795_v13 = vsel %vm545_vm0, %v778_v33, %v779_v45 }
  0xf3   : >> { %v788_v7 = vrot.slane %v5446_v21, 1  ;;  %v793_v46 = vsel %vm545_vm0, %v781_v56, %v782_v14  ;;  %v790_v62 = vsel %vm545_vm0, %v786_v19, %v787_v2  ;;  %v796_v50 = vsel %vm545_vm0, %v777_v26, %v778_v33  ;;  %v5447_v26 = vld [vmem:[#allocation25_spill] sm:$0xff] }
  0xf4   : >> { %v791_v21 = vsel %vm545_vm0, %v784_v52, %v785_v53  ;;  %v797_v14 = vsel %vm545_vm0, %v775_v59, %v776_v25  ;;  %v798_v49 = vsel %vm545_vm0, %v774_v18, %v775_v59  ;;  %v799_v45 = vsel %vm545_vm0, %v772_v22, %v773_v10 }
  0xf5   : >> { %v789_v32 = vsel %vm545_vm0, %v787_v2, %v788_v7  ;;  %v800_v7 = vsel %vm545_vm0, %v771_v51, %v772_v22  ;;  %v801_v19 = vsel %vm545_vm0, %v769_v12, %v770_v5  ;;  %v802_v53 = vsel %vm545_vm0, %v768_v58, %v769_v12 }
  0xf6   : >> { %v803_v2 = vsel %vm545_vm0, %v766_v47, %v767_v30  ;;  %v804_v25 = vsel %vm545_vm0, %v765_v41, %v766_v47  ;;  %v811_v10 = vmul.f32 %v5447_v26, %v802_v53  ;;  %v812_v51 = vmul.f32 %v5447_v26, %v801_v19 }
  0xf7   : >> { %v809_v18 = vmul.f32 %v5447_v26, %v804_v25  ;;  %v810_v59 = vmul.f32 %v5447_v26, %v803_v2  ;;  %v813_v22 = vmul.f32 %v5447_v26, %v800_v7  ;;  %v814_v5 = vmul.f32 %v5447_v26, %v799_v45 }
  0xf8   : >> { %v815_v58 = vmul.f32 %v5447_v26, %v798_v49  ;;  %v816_v12 = vmul.f32 %v5447_v26, %v797_v14  ;;  %v817_v30 = vmul.f32 %v5447_v26, %v796_v50  ;;  %v818_v41 = vmul.f32 %v5447_v26, %v795_v13 }
  0xf9   : >> { %v819_v47 = vmul.f32 %v5447_v26, %v794_v28  ;;  %v820_v33 = vmul.f32 %v5447_v26, %v793_v46  ;;  %v821_v56 = vmul.f32 %v5447_v26, %v792_v1  ;;  %v822_v52 = vmul.f32 %v5447_v26, %v791_v21 }
  0xfa   : >> { %v823_v7 = vmul.f32 %v5447_v26, %v790_v62  ;;  %v824_v45 = vmul.f32 %v5447_v26, %v789_v32  ;;  %v4502_v49 = vadd.f32 %v809_v18, %v4374_v17  ;;  %v4505_v50 = vadd.f32 %v810_v59, %v4377_v36  ;;  %v5454_v18 = vld [vmem:[#allocation31_spill] sm:$0xff]  ;;  %v5455_v59 = vld [vmem:[#allocation30_spill] sm:$0xff] }
  0xfb   : >> { %v4508_v13 = vadd.f32 %v811_v10, %v4380_v40  ;;  %v4511_v28 = vadd.f32 %v812_v51, %v4383_v55  ;;  %v4514_v1 = vadd.f32 %v813_v22, %v4386_v3  ;;  %v4517_v62 = vadd.f32 %v814_v5, %v4389_v16  ;;  %v5457_v51 = vld [vmem:[#allocation36_spill] sm:$0xff]  ;;  %v5459_v5 = vld [vmem:[#allocation37_spill] sm:$0xff] }
  0xfc   : >> { %v4520_v46 = vadd.f32 %v815_v58, %v4392_v61  ;;  %v4523_v17 = vadd.f32 %v816_v12, %v4395_v37  ;;  %v4526_v36 = vadd.f32 %v817_v30, %v4398_v31  ;;  %v4529_v40 = vadd.f32 %v818_v41, %v4401_v38  ;;  %v5460_v12 = vld [vmem:[#allocation34_spill] sm:$0xff] }
  0xfd   : >> { %v4532_v55 = vadd.f32 %v819_v47, %v4404_v0  ;;  %v4535_v3 = vadd.f32 %v820_v33, %v4407_v39  ;;  %v4538_v16 = vadd.f32 %v821_v56, %v4410_v42  ;;  %v4541_v61 = vadd.f32 %v822_v52, %v4413_v6  ;;  %v5462_v33 = vld [vmem:[#allocation33_spill] sm:$0xff] }
  0xfe   : >> { %v4544_v37 = vadd.f32 %v823_v7, %v4416_v4  ;;  %v4547_v31 = vadd.f32 %v824_v45, %v4419_v43  ;;  %v841_v38 = vrot.slane %v4279_v27, 2  ;;  %v842_v0 = vrot.slane %v4281_v54, 2 }
  0xff   : >> { %v5448_v39 = vunpack.c.l.bf16 %v4243_v35  ;;  %v844_v6 = vrot.slane %v4285_v34, 2  ;;  %v845_v32 = vrot.slane %v4292_v57, 2  ;;  %v5449_v4 = vunpack.c.h.bf16 %v4258_v48  ;;  %v5451_v35 = vld [vmem:[#allocation32_spill] sm:$0xff]  ;;  %v5453_v34 = vld [vmem:[#allocation35_spill] sm:$0xff] }
 0x100   : >> { %v847_v43 = vrot.slane %v4295_v29, 2  ;;  %v848_v14 = vrot.slane %v4297_v60, 2  ;;  %v5450_v19 = vunpack.c.l.bf16 %v4274_v20  ;;  %v850_v27 = vrot.slane %v4305_v63, 2 }
 0x101   : >> { %v843_v42 = vrot.slane %v5448_v39, 2  ;;  %v846_v21 = vrot.slane %v5449_v4, 2  ;;  %v851_v54 = vrot.slane %v4308_v8, 2  ;;  %v5452_v2 = vunpack.c.h.bf16 %v5451_v35 }
 0x102   : >> { %v849_v53 = vrot.slane %v5450_v19, 2  ;;  %v853_v57 = vrot.slane %v5453_v34, 2  ;;  %v854_v48 = vrot.slane %v5454_v18, 2  ;;  %v5456_v10 = vunpack.c.l.bf16 %v5455_v59 }
 0x103   : >> { %v852_v25 = vrot.slane %v5452_v2, 2  ;;  %v856_v60 = vrot.slane %v4323_v23, 2  ;;  %v857_v20 = vrot.slane %v5457_v51, 2  ;;  %v5458_v22 = vunpack.c.h.bf16 %v4300_v44 }
 0x104   : >> { %v855_v29 = vrot.slane %v5456_v10, 2  ;;  %v859_v8 = vrot.slane %v5459_v5, 2  ;;  %v860_v58 = vrot.slane %v4331_v11, 2  ;;  %v5461_v30 = vunpack.c.l.bf16 %v5460_v12 }
 0x105   : >> { %v858_v63 = vrot.slane %v5458_v22, 2  ;;  %v862_v47 = vrot.slane %v4335_v24, 2  ;;  %v863_v56 = vrot.slane %v5462_v33, 2  ;;  %v5463_v52 = vunpack.c.h.bf16 %v4315_v9  ;;  %v4694_v33 = vld [vmem:[%s4631_s25 + $0x20] sm:$0xff]  }
 0x106   : >> { %v861_v41 = vrot.slane %v5461_v30, 2  ;;  %v868_v23 = vsel %vm622_vm1, %v859_v8, %v860_v58  ;;  %v870_v45 = vsel %vm622_vm1, %v856_v60, %v857_v20  ;;  %v871_v11 = vsel %vm622_vm1, %v854_v48, %v855_v29  ;;  %v2561_v30 = vld [vmem:[%s4631_s25] sm:$0xff]  }
 0x107   : >> { %v864_v7 = vrot.slane %v5463_v52, 2  ;;  %v869_v44 = vsel %vm622_vm1, %v857_v20, %v858_v63  ;;  %v866_v9 = vsel %vm622_vm1, %v862_v47, %v863_v56  ;;  %v872_v4 = vsel %vm622_vm1, %v853_v57, %v854_v48 }
 0x108   : >> { %v867_v39 = vsel %vm622_vm1, %v860_v58, %v861_v41  ;;  %v873_v19 = vsel %vm622_vm1, %v851_v54, %v852_v25  ;;  %v874_v35 = vsel %vm622_vm1, %v850_v27, %v851_v54  ;;  %v875_v2 = vsel %vm622_vm1, %v848_v14, %v849_v53  ;;  %v5464_v27 = vld [vmem:[#allocation26_spill] sm:$0xff] }
 0x109   : >> { %v865_v24 = vsel %vm622_vm1, %v863_v56, %v864_v7  ;;  %v876_v34 = vsel %vm622_vm1, %v847_v43, %v848_v14  ;;  %v877_v18 = vsel %vm622_vm1, %v845_v32, %v846_v21  ;;  %v878_v59 = vsel %vm622_vm1, %v844_v6, %v845_v32  ;;  %v4678_v41 = vld [vmem:[%s4631_s25 + $0x10] sm:$0xff]   ;;  %v4709_v7 = vld [vmem:[%s4631_s25 + $0x38] sm:$0xff]  }
 0x10a   : >> { %v879_v57 = vsel %vm622_vm1, %v842_v0, %v843_v42  ;;  %v880_v25 = vsel %vm622_vm1, %v841_v38, %v842_v0  ;;  %v887_v43 = vmul.f32 %v5464_v27, %v878_v59  ;;  %v888_v14 = vmul.f32 %v5464_v27, %v877_v18  ;;  %5466 = vst [vmem:[#allocation32_spill] sm:$0xff] %v4709_v7 }
 0x10b   : >> { %v885_v54 = vmul.f32 %v5464_v27, %v880_v25  ;;  %v886_v53 = vmul.f32 %v5464_v27, %v879_v57  ;;  %v889_v21 = vmul.f32 %v5464_v27, %v876_v34  ;;  %v890_v6 = vmul.f32 %v5464_v27, %v875_v2  ;;  %v4735_v2 = vld [vmem:[%s4631_s25 + $0x58] sm:$0xff]  }
 0x10c   : >> { %v891_v32 = vmul.f32 %v5464_v27, %v874_v35  ;;  %v892_v42 = vmul.f32 %v5464_v27, %v873_v19  ;;  %v893_v48 = vmul.f32 %v5464_v27, %v872_v4  ;;  %v894_v38 = vmul.f32 %v5464_v27, %v871_v11  ;;  %v4720_v11 = vld [vmem:[%s4631_s25 + $0x40] sm:$0xff]   ;;  %v4732_v35 = vld [vmem:[%s4631_s25 + $0x50] sm:$0xff]  }
 0x10d   : >> { %v895_v0 = vmul.f32 %v5464_v27, %v870_v45  ;;  %v896_v10 = vmul.f32 %v5464_v27, %v869_v44  ;;  %v897_v29 = vmul.f32 %v5464_v27, %v868_v23  ;;  %v898_v60 = vmul.f32 %v5464_v27, %v867_v39  ;;  %5467 = vst [vmem:[#allocation35_spill] sm:$0xff] %v4732_v35 }
 0x10e   : >> { %v899_v51 = vmul.f32 %v5464_v27, %v866_v9  ;;  %v900_v20 = vmul.f32 %v5464_v27, %v865_v24  ;;  %v4638_v22 = vadd.f32 %v885_v54, %v4502_v49  ;;  %v4641_v63 = vadd.f32 %v886_v53, %v4505_v50  ;;  %v2906_v24 = vld [vmem:[%s4631_s25 + $0x48] sm:$0xff]  }
 0x10f   : >> { %v4644_v5 = vadd.f32 %v887_v43, %v4508_v13  ;;  %v4647_v8 = vadd.f32 %v888_v14, %v4511_v28  ;;  %v4650_v58 = vadd.f32 %v889_v21, %v4514_v1  ;;  %v4653_v12 = vadd.f32 %v890_v6, %v4517_v62  ;;  %v4663_v13 = vld [vmem:[%s4631_s25 + $0x8] sm:$0xff]  }
 0x110   : >> { %v4656_v49 = vadd.f32 %v891_v32, %v4520_v46  ;;  %v4659_v50 = vadd.f32 %v892_v42, %v4523_v17  ;;  %v4666_v28 = vadd.f32 %v893_v48, %v4526_v36  ;;  %v4669_v1 = vadd.f32 %v894_v38, %v4529_v40  ;;  %v2900_v17 = vld [vmem:[%s4631_s25 + $0x18] sm:$0xff]  }
 0x111   : >> { %v4672_v62 = vadd.f32 %v895_v0, %v4532_v55  ;;  %v4675_v46 = vadd.f32 %v896_v10, %v4535_v3  ;;  %v4682_v47 = vadd.f32 %v897_v29, %v4538_v16  ;;  %v4685_v36 = vadd.f32 %v898_v60, %v4541_v61  ;;  %v4697_v3 = vld [vmem:[%s4631_s25 + $0x28] sm:$0xff]   ;;  %v5473_v42 = vld [vmem:[#allocation27_spill] sm:$0xff] }
 0x112   : >> { %v4688_v40 = vadd.f32 %v899_v51, %v4544_v37  ;;  %v4691_v55 = vadd.f32 %v900_v20, %v4547_v31  ;;  %5465 = vst [vmem:[#allocation38_spill] sm:$0xff] %v4697_v3  ;;  %v4699_v56 = vunpack.c.l.bf16 %v2561_v30  ;;  %v4701_v16 = vunpack.c.h.bf16 %v2561_v30  ;;  %v2903_v37 = vld [vmem:[%s4631_s25 + $0x30] sm:$0xff]   ;;  %s5502_s25 = sld [smem:[#allocation39_spill]] (%p425_p3) }
 0x113   : >> { %v4705_v52 = vunpack.c.h.bf16 %v4663_v13  ;;  %v4712_v31 = vunpack.c.l.bf16 %v4678_v41  ;;  %v4715_v44 = vunpack.c.l.bf16 %v2900_v17  ;;  %v4717_v45 = vunpack.c.h.bf16 %v2900_v17 }
 0x114   : >> { %v4725_v39 = vunpack.c.h.bf16 %v4694_v33  ;;  %v4728_v4 = vunpack.c.l.bf16 %v4697_v3  ;;  %v4737_v34 = vunpack.c.l.bf16 %v2903_v37  ;;  %v4739_v18 = vunpack.c.h.bf16 %v2903_v37 }
 0x115   : >> { %v4743_v57 = vunpack.c.h.bf16 %v4709_v7  ;;  %v4746_v25 = vunpack.c.l.bf16 %v4720_v11  ;;  %v4749_v53 = vunpack.c.l.bf16 %v2906_v24  ;;  %v4751_v43 = vunpack.c.h.bf16 %v2906_v24 }
 0x116   : >> { %5468 = vst [vmem:[#allocation31_spill] sm:$0xff] %v4737_v34  ;;  %5469 = vst [vmem:[#allocation30_spill] sm:$0xff] %v4739_v18  ;;  %v4755_v21 = vunpack.c.h.bf16 %v4732_v35  ;;  %v4758_v6 = vunpack.c.l.bf16 %v4735_v2  ;;  %v975_v48 = vmul.f32 %v4699_v56, %v5473_v42  ;;  %v976_v38 = vmul.f32 %v4701_v16, %v5473_v42 }
 0x117   : >> { %5470 = vst [vmem:[#allocation36_spill] sm:$0xff] %v4746_v25  ;;  %5471 = vst [vmem:[#allocation37_spill] sm:$0xff] %v4749_v53  ;;  %v977_v0 = vmul.f32 %v4705_v52, %v5473_v42  ;;  %v978_v10 = vmul.f32 %v4712_v31, %v5473_v42  ;;  %v979_v29 = vmul.f32 %v4715_v44, %v5473_v42 }
 0x118   : >> { %5472 = vst [vmem:[#allocation34_spill] sm:$0xff] %v4758_v6  ;;  %v980_v60 = vmul.f32 %v4717_v45, %v5473_v42  ;;  %v981_v51 = vmul.f32 %v4725_v39, %v5473_v42  ;;  %v982_v20 = vmul.f32 %v4728_v4, %v5473_v42  ;;  %v983_v30 = vmul.f32 %v4737_v34, %v5473_v42 }
 0x119   : >> { %v984_v17 = vmul.f32 %v4739_v18, %v5473_v42  ;;  %v985_v37 = vmul.f32 %v4743_v57, %v5473_v42  ;;  %v986_v24 = vmul.f32 %v4746_v25, %v5473_v42  ;;  %v987_v32 = vmul.f32 %v4749_v53, %v5473_v42 }
 0x11a   : >> { %v988_v14 = vmul.f32 %v4751_v43, %v5473_v42  ;;  %v989_v54 = vmul.f32 %v4755_v21, %v5473_v42  ;;  %v990_v59 = vmul.f32 %v4758_v6, %v5473_v42  ;;  %v4794_v19 = vadd.f32 %v975_v48, %v4638_v22 }
 0x11b   : >> { %v4797_v9 = vadd.f32 %v976_v38, %v4641_v63  ;;  %v4800_v23 = vadd.f32 %v977_v0, %v4644_v5  ;;  %v4803_v61 = vadd.f32 %v978_v10, %v4647_v8  ;;  %v4806_v26 = vadd.f32 %v979_v29, %v4650_v58 }
 0x11c   : >> { %v4809_v27 = vadd.f32 %v980_v60, %v4653_v12  ;;  %v4812_v42 = vadd.f32 %v981_v51, %v4656_v49  ;;  %v4815_v22 = vadd.f32 %v982_v20, %v4659_v50  ;;  %v4818_v63 = vadd.f32 %v983_v30, %v4666_v28 }
 0x11d   : >> { %v4821_v5 = vadd.f32 %v984_v17, %v4669_v1  ;;  %v4824_v8 = vadd.f32 %v985_v37, %v4672_v62  ;;  %v4827_v58 = vadd.f32 %v986_v24, %v4675_v46  ;;  %v4830_v12 = vadd.f32 %v987_v32, %v4682_v47 }
 0x11e   : >> { %v4833_v49 = vadd.f32 %v988_v14, %v4685_v36  ;;  %v4836_v50 = vadd.f32 %v989_v54, %v4688_v40  ;;  %v4839_v28 = vadd.f32 %v990_v59, %v4691_v55  ;;  %v1007_v1 = vrot.slane %v4699_v56, 1 }
 0x11f   : >> { %v1008_v62 = vrot.slane %v4701_v16, 1  ;;  %v5474_v48 = vunpack.c.l.bf16 %v4663_v13  ;;  %v1010_v38 = vrot.slane %v4705_v52, 1  ;;  %v1011_v47 = vrot.slane %v4712_v31, 1 }
 0x120   : >> { %v5475_v36 = vunpack.c.h.bf16 %v4678_v41  ;;  %v1013_v40 = vrot.slane %v4715_v44, 1  ;;  %v1014_v54 = vrot.slane %v4717_v45, 1  ;;  %v5476_v55 = vunpack.c.l.bf16 %v4694_v33 }
 0x121   : >> { %v1009_v46 = vrot.slane %v5474_v48, 1  ;;  %v1016_v32 = vrot.slane %v4725_v39, 1  ;;  %v1017_v0 = vrot.slane %v4728_v4, 1  ;;  %v5477_v10 = vunpack.c.h.bf16 %v4697_v3 }
 0x122   : >> { %v1012_v14 = vrot.slane %v5475_v36, 1  ;;  %v1015_v59 = vrot.slane %v5476_v55, 1  ;;  %v1019_v60 = vrot.slane %v4737_v34, 1  ;;  %v1020_v51 = vrot.slane %v4739_v18, 1 }
 0x123   : >> { %v1018_v29 = vrot.slane %v5477_v10, 1  ;;  %v5478_v20 = vunpack.c.l.bf16 %v4709_v7  ;;  %v1022_v17 = vrot.slane %v4743_v57, 1  ;;  %v1023_v37 = vrot.slane %v4746_v25, 1 }
 0x124   : >> { %v5479_v24 = vunpack.c.h.bf16 %v4720_v11  ;;  %v1025_v36 = vrot.slane %v4749_v53, 1  ;;  %v1026_v55 = vrot.slane %v4751_v43, 1  ;;  %v5480_v10 = vunpack.c.l.bf16 %v4732_v35 }
 0x125   : >> { %v1021_v30 = vrot.slane %v5478_v20, 1  ;;  %v1028_v34 = vrot.slane %v4755_v21, 1  ;;  %v1029_v18 = vrot.slane %v4758_v6, 1  ;;  %v5481_v20 = vunpack.c.h.bf16 %v4735_v2 }
 0x126   : >> { %v1024_v48 = vrot.slane %v5479_v24, 1  ;;  %v1027_v3 = vrot.slane %v5480_v10, 1  ;;  %v1034_v25 = vsel %vm545_vm0, %v1025_v36, %v1026_v55  ;;  %v1036_v53 = vsel %vm545_vm0, %v1022_v17, %v1023_v37 }
 0x127   : >> { %v1030_v7 = vrot.slane %v5481_v20, 1  ;;  %v1037_v35 = vsel %vm545_vm0, %v1020_v51, %v1021_v30  ;;  %v1032_v6 = vsel %vm545_vm0, %v1028_v34, %v1029_v18  ;;  %v1038_v36 = vsel %vm545_vm0, %v1019_v60, %v1020_v51  ;;  %v5482_v60 = vld [vmem:[#allocation28_spill] sm:$0xff] }
 0x128   : >> { %v1035_v24 = vsel %vm545_vm0, %v1023_v37, %v1024_v48  ;;  %v1033_v20 = vsel %vm545_vm0, %v1026_v55, %v1027_v3  ;;  %v1039_v48 = vsel %vm545_vm0, %v1017_v0, %v1018_v29  ;;  %v1040_v17 = vsel %vm545_vm0, %v1016_v32, %v1017_v0 }
 0x129   : >> { %v1031_v10 = vsel %vm545_vm0, %v1029_v18, %v1030_v7  ;;  %v1041_v30 = vsel %vm545_vm0, %v1014_v54, %v1015_v59  ;;  %v1042_v7 = vsel %vm545_vm0, %v1013_v40, %v1014_v54  ;;  %v1043_v34 = vsel %vm545_vm0, %v1011_v47, %v1012_v14 }
 0x12a   : >> { %v1044_v3 = vsel %vm545_vm0, %v1010_v38, %v1011_v47  ;;  %v1045_v18 = vsel %vm545_vm0, %v1008_v62, %v1009_v46  ;;  %v1046_v29 = vsel %vm545_vm0, %v1007_v1, %v1008_v62  ;;  %v1054_v40 = vmul.f32 %v5482_v60, %v1043_v34 }
 0x12b   : >> { %v1051_v32 = vmul.f32 %v5482_v60, %v1046_v29  ;;  %v1052_v0 = vmul.f32 %v5482_v60, %v1045_v18  ;;  %v1053_v59 = vmul.f32 %v5482_v60, %v1044_v3  ;;  %v1055_v54 = vmul.f32 %v5482_v60, %v1042_v7 }
 0x12c   : >> { %v1056_v14 = vmul.f32 %v5482_v60, %v1041_v30  ;;  %v1057_v38 = vmul.f32 %v5482_v60, %v1040_v17  ;;  %v1058_v47 = vmul.f32 %v5482_v60, %v1039_v48  ;;  %v1059_v46 = vmul.f32 %v5482_v60, %v1038_v36 }
 0x12d   : >> { %v1060_v1 = vmul.f32 %v5482_v60, %v1037_v35  ;;  %v1061_v62 = vmul.f32 %v5482_v60, %v1036_v53  ;;  %v1062_v51 = vmul.f32 %v5482_v60, %v1035_v24  ;;  %v1063_v37 = vmul.f32 %v5482_v60, %v1034_v25 }
 0x12e   : >> { %v1064_v55 = vmul.f32 %v5482_v60, %v1033_v20  ;;  %v1065_v7 = vmul.f32 %v5482_v60, %v1032_v6  ;;  %v1066_v30 = vmul.f32 %v5482_v60, %v1031_v10  ;;  %v4922_v17 = vadd.f32 %v1051_v32, %v4794_v19  ;;  %v2913_v60 = vld [vmem:[#allocation9 + $0x28] sm:$0xff] (%p425_p3)  }
 0x12f   : >> { %v4925_v48 = vadd.f32 %v1052_v0, %v4797_v9  ;;  %v4928_v35 = vadd.f32 %v1053_v59, %v4800_v23  ;;  %v4931_v53 = vadd.f32 %v1054_v40, %v4803_v61  ;;  %v4934_v25 = vadd.f32 %v1055_v54, %v4806_v26 }
 0x130   : >> { %v4937_v24 = vadd.f32 %v1056_v14, %v4809_v27  ;;  %v4940_v6 = vadd.f32 %v1057_v38, %v4812_v42  ;;  %v4943_v19 = vadd.f32 %v1058_v47, %v4815_v22  ;;  %v4946_v9 = vadd.f32 %v1059_v46, %v4818_v63  ;;  %v5495_v47 = vld [vmem:[#allocation35_spill] sm:$0xff] }
 0x131   : >> { %v4949_v23 = vadd.f32 %v1060_v1, %v4821_v5  ;;  %v4952_v61 = vadd.f32 %v1061_v62, %v4824_v8  ;;  %v4955_v26 = vadd.f32 %v1062_v51, %v4827_v58  ;;  %v4958_v27 = vadd.f32 %v1063_v37, %v4830_v12  ;;  %v5497_v51 = vld [vmem:[#allocation34_spill] sm:$0xff] }
 0x132   : >> { %v4961_v42 = vadd.f32 %v1064_v55, %v4833_v49  ;;  %v4964_v22 = vadd.f32 %v1065_v7, %v4836_v50  ;;  %v4967_v63 = vadd.f32 %v1066_v30, %v4839_v28  ;;  %v1083_v5 = vrot.slane %v4699_v56, 2 }
 0x133   : >> { %v1084_v8 = vrot.slane %v4701_v16, 2  ;;  %v5483_v10 = vunpack.c.l.bf16 %v4663_v13  ;;  %v1086_v20 = vrot.slane %v4705_v52, 2  ;;  %v1087_v12 = vrot.slane %v4712_v31, 2  ;;  %v5486_v13 = vld [vmem:[#allocation38_spill] sm:$0xff]  ;;  %v5488_v52 = vld [vmem:[#allocation31_spill] sm:$0xff] }
 0x134   : >> { %v5484_v49 = vunpack.c.h.bf16 %v4678_v41  ;;  %v1089_v50 = vrot.slane %v4715_v44, 2  ;;  %v1090_v34 = vrot.slane %v4717_v45, 2  ;;  %v5485_v28 = vunpack.c.l.bf16 %v4694_v33  ;;  %v5489_v31 = vld [vmem:[#allocation30_spill] sm:$0xff]  ;;  %v5490_v41 = vld [vmem:[#allocation32_spill] sm:$0xff] }
 0x135   : >> { %v1085_v58 = vrot.slane %v5483_v10, 2  ;;  %v1092_v56 = vrot.slane %v4725_v39, 2  ;;  %v1093_v16 = vrot.slane %v4728_v4, 2  ;;  %v5487_v18 = vunpack.c.h.bf16 %v5486_v13  ;;  %v5492_v45 = vld [vmem:[#allocation36_spill] sm:$0xff]  ;;  %v5494_v39 = vld [vmem:[#allocation37_spill] sm:$0xff] }
 0x136   : >> { %v1088_v36 = vrot.slane %v5484_v49, 2  ;;  %v1091_v3 = vrot.slane %v5485_v28, 2  ;;  %v1095_v32 = vrot.slane %v5488_v52, 2  ;;  %v1096_v0 = vrot.slane %v5489_v31, 2 }
 0x137   : >> { %v1094_v29 = vrot.slane %v5487_v18, 2  ;;  %v5491_v59 = vunpack.c.l.bf16 %v5490_v41  ;;  %v1098_v44 = vrot.slane %v4743_v57, 2  ;;  %v1099_v54 = vrot.slane %v5492_v45, 2 }
 0x138   : >> { %v5493_v33 = vunpack.c.h.bf16 %v4720_v11  ;;  %v1101_v38 = vrot.slane %v5494_v39, 2  ;;  %v1102_v4 = vrot.slane %v4751_v43, 2  ;;  %v5496_v46 = vunpack.c.l.bf16 %v5495_v47 }
 0x139   : >> { %v1097_v40 = vrot.slane %v5491_v59, 2  ;;  %v1104_v62 = vrot.slane %v4755_v21, 2  ;;  %v1105_v37 = vrot.slane %v5497_v51, 2  ;;  %v5498_v55 = vunpack.c.h.bf16 %v4735_v2 }
 0x13a   : >> { %v1100_v14 = vrot.slane %v5493_v33, 2  ;;  %v1103_v1 = vrot.slane %v5496_v46, 2  ;;  %v1110_v57 = vsel %vm622_vm1, %v1101_v38, %v1102_v4  ;;  %v1112_v30 = vsel %vm622_vm1, %v1098_v44, %v1099_v54 }
 0x13b   : >> { %v1106_v7 = vrot.slane %v5498_v55, 2  ;;  %v1113_v43 = vsel %vm622_vm1, %v1096_v0, %v1097_v40  ;;  %v1108_v10 = vsel %vm622_vm1, %v1104_v62, %v1105_v37  ;;  %v1114_v49 = vsel %vm622_vm1, %v1095_v32, %v1096_v0  ;;  %v5499_v0 = vld [vmem:[#allocation29_spill] sm:$0xff] }
 0x13c   : >> { %v1111_v11 = vsel %vm622_vm1, %v1099_v54, %v1100_v14  ;;  %v1109_v2 = vsel %vm622_vm1, %v1102_v4, %v1103_v1  ;;  %v1115_v28 = vsel %vm622_vm1, %v1093_v16, %v1094_v29  ;;  %v1116_v13 = vsel %vm622_vm1, %v1092_v56, %v1093_v16 }
 0x13d   : >> { %v1107_v21 = vsel %vm622_vm1, %v1105_v37, %v1106_v7  ;;  %v1117_v18 = vsel %vm622_vm1, %v1090_v34, %v1091_v3  ;;  %v1118_v52 = vsel %vm622_vm1, %v1089_v50, %v1090_v34  ;;  %v1119_v31 = vsel %vm622_vm1, %v1087_v12, %v1088_v36  ;;  %v5500_v37 = vld [vmem:[#allocation20_spill] sm:$0xff] }
 0x13e   : >> { %v1120_v41 = vsel %vm622_vm1, %v1086_v20, %v1087_v12  ;;  %v1121_v32 = vsel %vm622_vm1, %v1084_v8, %v1085_v58  ;;  %v1122_v29 = vsel %vm622_vm1, %v1083_v5, %v1084_v8  ;;  %v1130_v50 = vmul.f32 %v5499_v0, %v1119_v31 }
 0x13f   : >> { %v1127_v56 = vmul.f32 %v5499_v0, %v1122_v29  ;;  %v1128_v16 = vmul.f32 %v5499_v0, %v1121_v32  ;;  %v1129_v3 = vmul.f32 %v5499_v0, %v1120_v41  ;;  %v1131_v34 = vmul.f32 %v5499_v0, %v1118_v52 }
 0x140   : >> { %v1132_v36 = vmul.f32 %v5499_v0, %v1117_v18  ;;  %v1133_v20 = vmul.f32 %v5499_v0, %v1116_v13  ;;  %v1134_v12 = vmul.f32 %v5499_v0, %v1115_v28  ;;  %v1135_v58 = vmul.f32 %v5499_v0, %v1114_v49 }
 0x141   : >> { %v1136_v5 = vmul.f32 %v5499_v0, %v1113_v43  ;;  %v1137_v8 = vmul.f32 %v5499_v0, %v1112_v30  ;;  %v1138_v59 = vmul.f32 %v5499_v0, %v1111_v11  ;;  %v1139_v40 = vmul.f32 %v5499_v0, %v1110_v57 }
 0x142   : >> { %v1140_v44 = vmul.f32 %v5499_v0, %v1109_v2  ;;  %v1141_v45 = vmul.f32 %v5499_v0, %v1108_v10  ;;  %v1142_v54 = vmul.f32 %v5499_v0, %v1107_v21  ;;  %v1143_v33 = vadd.f32 %v1127_v56, %v4922_v17  ;;  %v2914_v0 = vld [vmem:[#allocation9 + $0x30] sm:$0xff] (%p425_p3)  }
 0x143   : >> { %v1144_v14 = vadd.f32 %v1128_v16, %v4925_v48  ;;  %v1145_v39 = vadd.f32 %v1129_v3, %v4928_v35  ;;  %v1146_v38 = vadd.f32 %v1130_v50, %v4931_v53  ;;  %v1147_v4 = vadd.f32 %v1131_v34, %v4934_v25 }
 0x144   : >> { %v1148_v47 = vadd.f32 %v1132_v36, %v4937_v24  ;;  %v1149_v46 = vadd.f32 %v1133_v20, %v4940_v6  ;;  %v1150_v1 = vadd.f32 %v1134_v12, %v4943_v19  ;;  %v1151_v62 = vadd.f32 %v1135_v58, %v4946_v9 }
 0x145   : >> { %v1152_v51 = vadd.f32 %v1136_v5, %v4949_v23  ;;  %v1153_v17 = vadd.f32 %v1137_v8, %v4952_v61  ;;  %v1154_v48 = vadd.f32 %v1138_v59, %v4955_v26  ;;  %v1155_v35 = vadd.f32 %v1139_v40, %v4958_v27 }
 0x146   : >> { %v1156_v53 = vadd.f32 %v1140_v44, %v4961_v42  ;;  %v1157_v25 = vadd.f32 %v1141_v45, %v4964_v22  ;;  %v1158_v24 = vadd.f32 %v1142_v54, %v4967_v63  ;;  %v1165_v6 = vadd.f32 %v5500_v37, %v1143_v33 }
 0x147   : >> { %v1166_v19 = vadd.f32 %v5500_v37, %v1144_v14  ;;  %v1167_v9 = vadd.f32 %v5500_v37, %v1145_v39  ;;  %v1168_v23 = vadd.f32 %v5500_v37, %v1146_v38  ;;  %v1169_v61 = vadd.f32 %v5500_v37, %v1147_v4 }
 0x148   : >> { %v1170_v26 = vadd.f32 %v5500_v37, %v1148_v47  ;;  %v1171_v27 = vadd.f32 %v5500_v37, %v1149_v46  ;;  %v1172_v42 = vadd.f32 %v5500_v37, %v1150_v1  ;;  %v1173_v22 = vadd.f32 %v5500_v37, %v1151_v62 }
 0x149   : >> { %v1174_v63 = vadd.f32 %v5500_v37, %v1152_v51  ;;  %v1175_v55 = vadd.f32 %v5500_v37, %v1153_v17  ;;  %v1176_v7 = vadd.f32 %v5500_v37, %v1154_v48  ;;  %v1177_v57 = vadd.f32 %v5500_v37, %v1155_v35 }
 0x14a   : >> { %v1178_v11 = vadd.f32 %v5500_v37, %v1156_v53  ;;  %v1179_v30 = vadd.f32 %v5500_v37, %v1157_v25  ;;  %v1180_v43 = vadd.f32 %v5500_v37, %v1158_v24  ;;  %v1181_v21 = vmax.f32 %v1165_v6, 0.0  ;;  %v1215_v6 = vld [vmem:[#allocation3] sm:$0x1] }
 0x14b   : >> { %v1182_v10 = vmax.f32 %v1166_v19, 0.0  ;;  %v1183_v2 = vmax.f32 %v1167_v9, 0.0  ;;  %v1184_v49 = vmax.f32 %v1168_v23, 0.0  ;;  %v1185_v28 = vmax.f32 %v1169_v61, 0.0  ;;  %v2609_v23 = vld [vmem:[#allocation9] sm:$0xff] (%p425_p3)  }
 0x14c   : >> { %v1186_v13 = vmax.f32 %v1170_v26, 0.0  ;;  %v1187_v18 = vmax.f32 %v1171_v27, 0.0  ;;  %v1188_v52 = vmax.f32 %v1172_v42, 0.0  ;;  %v1189_v31 = vmax.f32 %v1173_v22, 0.0  ;;  %v2909_v27 = vld [vmem:[#allocation9 + $0x8] sm:$0xff] (%p425_p3)   ;;  %v2910_v42 = vld [vmem:[#allocation9 + $0x10] sm:$0xff] (%p425_p3)  }
 0x14d   : >> { %v1190_v41 = vmax.f32 %v1174_v63, 0.0  ;;  %v1191_v32 = vmax.f32 %v1175_v55, 0.0  ;;  %v1192_v29 = vmax.f32 %v1176_v7, 0.0  ;;  %v1193_v56 = vmax.f32 %v1177_v57, 0.0  ;;  %v2911_v22 = vld [vmem:[#allocation9 + $0x18] sm:$0xff] (%p425_p3)   ;;  %v2912_v63 = vld [vmem:[#allocation9 + $0x20] sm:$0xff] (%p425_p3)  }
 0x14e   : >> { %v1194_v16 = vmax.f32 %v1178_v11, 0.0  ;;  %v1195_v3 = vmax.f32 %v1179_v30, 0.0  ;;  %v1196_v50 = vmax.f32 %v1180_v43, 0.0  ;;  %v1197_v34 = vpack.c.bf16 %v1182_v10, %v1181_v21  ;;  %v2915_v55 = vld [vmem:[#allocation9 + $0x38] sm:$0xff] (%p425_p3)   ;;  %v2641_v57 = vld [vmem:[#allocation10] sm:$0xff] (%p425_p3)   ;;  %v2916_v11 = vld [vmem:[#allocation10 + $0x8] sm:$0xff] (%p425_p3)  }
 0x14f   : >> { %v1198_v36 = vpack.c.bf16 %v1184_v49, %v1183_v2  ;;  %v1199_v20 = vpack.c.bf16 %v1186_v13, %v1185_v28  ;;  %v1200_v12 = vpack.c.bf16 %v1188_v52, %v1187_v18  ;;  %v1201_v58 = vpack.c.bf16 %v1190_v41, %v1189_v31  ;;  %v2917_v30 = vld [vmem:[#allocation10 + $0x10] sm:$0xff] (%p425_p3)   ;;  %v2918_v43 = vld [vmem:[#allocation10 + $0x18] sm:$0xff] (%p425_p3)  }
 0x150   : >> { %v1202_v5 = vpack.c.bf16 %v1192_v29, %v1191_v32  ;;  %v1203_v8 = vpack.c.bf16 %v1194_v16, %v1193_v56  ;;  %v1204_v59 = vpack.c.bf16 %v1196_v50, %v1195_v3  ;;  %1207 = vst [vmem:[%s1206_s30] sm:$0xff] %v1197_v34  ;;  %v1216_v40 = vadd.f32 %v1182_v10, %v1181_v21  ;;  %v2919_v21 = vld [vmem:[#allocation10 + $0x20] sm:$0xff] (%p425_p3)   ;;  %v2920_v10 = vld [vmem:[#allocation10 + $0x28] sm:$0xff] (%p425_p3)  }
 0x151   : >> { %1208 = vst [vmem:[%s1206_s30 + $0x8] sm:$0xff] %v1198_v36  ;;  %1209 = vst [vmem:[%s1206_s30 + $0x10] sm:$0xff] %v1199_v20  ;;  %v3535_v61 = vmov (%p425_p3), 0.0|0.0   ;;  %v5501_v26 = vmov (%p425_p3), 0.0   ;;  %v1488_v34 = vsub.s32 (%p425_p3), 0, %v3872_v15 }
 0x152   : >> { %1210 = vst [vmem:[%s1206_s30 + $0x18] sm:$0xff] %v1200_v12  ;;  %1211 = vst [vmem:[%s1206_s30 + $0x20] sm:$0xff] %v1201_v58  ;;  %v1217_v44 = vadd.f32 %v1216_v40, %v1183_v2  ;;  %3144 = vmatprep.subr.bf16.mxu1 (%p425_p3), %v3535_v61  ;;  %3058 = vmatprep.mubr.msk.f32.mxu1 (%p425_p3), %vm3536_vm2, %v5501_v26  ;;  %v2921_v2 = vld [vmem:[#allocation10 + $0x30] sm:$0xff] (%p425_p3)   ;;  %v2673_v58 = vld [vmem:[#allocation12] sm:$0xff] (%p425_p3)  }
 0x153   : >> { %1212 = vst [vmem:[%s1206_s30 + $0x28] sm:$0xff] %v1202_v5  ;;  %1213 = vst [vmem:[%s1206_s30 + $0x30] sm:$0xff] %v1203_v8  ;;  %3146 = vmatpush3.bf16.msra.mxu1 (%p425_p3), %v2609_v23  ;;  %v2923_v5 = vld [vmem:[#allocation12 + $0x8] sm:$0xff] (%p425_p3)   ;;  %v2674_v40 = vunpack.c.l.bf16 (%p425_p3), %v2673_v58 }
 0x154   : >> { %1214 = vst [vmem:[%s1206_s30 + $0x38] sm:$0xff] %v1204_v59  ;;  %v1218_v45 = vadd.f32 %v1217_v44, %v1184_v49  ;;  %3147 = vmatprep.subr.bf16.mxu1 (%p425_p3), %v3535_v61  ;;  %v2922_v49 = vld [vmem:[#allocation10 + $0x38] sm:$0xff] (%p425_p3)   ;;  %v2679_v44 = vunpack.c.h.bf16 (%p425_p3), %v2923_v5  ;;  %s3443_s30 = scalar_lea.vmem (%p425_p3), %s5258_s20, 2048 }
 0x155   : > { %p3444_p5 = scmp.ne.s32.totalorder (%p425_p3), %s5258_s20, %s3443_s30  ;;  %p3451_p2 = scmp.lt.s32.totalorder (%p425_p3), %s3449_s19, %s3443_s30 }
 0x156   : >> { %v1219_v54 = vadd.f32 %v1218_v45, %v1185_v28  ;;  %v1273_v28 = vld [vmem:[%s5308_s4] sm:$0x1] (%p425_p3)  ;;  %v2675_v45 = vunpack.c.h.bf16 (%p425_p3), %v2673_v58 }
 0x157   : > { %3149 = vmatpush3.bf16.msra.mxu1 (%p425_p3), %v2909_v27  ;;  %p3445_p7 = pnand (%p425_p3), %p3444_p5, %p3761_p10  ;;  %p3452_p13 = por (%p425_p3), %p3451_p2, %p3450_p1 }
 0x158   : >> { %v1220_v33 = vadd.f32 %v1219_v54, %v1186_v13  ;;  %3150 = vmatprep.subr.bf16.mxu1 (%p425_p3), %v3535_v61  ;;  %v2924_v54 = vld [vmem:[#allocation12 + $0x10] sm:$0xff] (%p425_p3)  }
 0x159   : > { %p3446_p12 = pneg (%p425_p3), %p3445_p7 }
 0x15a   : >> { %v1221_v14 = vadd.f32 %v1220_v33, %v1187_v18  ;;  %v2678_v33 = vunpack.c.l.bf16 (%p425_p3), %v2923_v5 }
 0x15b   : > { %3152 = vmatpush3.bf16.msra.mxu1 (%p425_p3), %v2910_v42  ;;  %v1578_v12 = vld [vmem:[#allocation2] sm:$0xff] (%p425_p3)  ;;  %v1579_v5 = vld [vmem:[#allocation2 + $0x8] sm:$0xff] (%p425_p3)  ;;  %p3453_p9 = pnand (%p425_p3), %p3452_p13, %p3446_p12 }
 0x15c   : >> { %v1222_v39 = vadd.f32 %v1221_v14, %v1188_v52  ;;  %3153 = vmatprep.subr.bf16.mxu1 (%p425_p3), %v3535_v61  ;;  %3112 = vmatprep.mubr.bf16.mxu0 (%p425_p3), %v1578_v12 }
 0x15e   : >> { %v1223_v38 = vadd.f32 %v1222_v39, %v1189_v31 }
 0x15f   : > { %3155 = vmatpush3.bf16.msra.mxu1 (%p425_p3), %v2911_v22 }
 0x160   : >> { %v1224_v4 = vadd.f32 %v1223_v38, %v1190_v41  ;;  %3156 = vmatprep.subr.bf16.mxu1 (%p425_p3), %v3535_v61  ;;  %v1377_v41 = vld [vmem:[%s5310_s6] sm:$0x1] (%p425_p3)  ;;  %v2683_v38 = vunpack.c.h.bf16 (%p425_p3), %v2924_v54 }
 0x162   : >> { %v1225_v47 = vadd.f32 %v1224_v4, %v1191_v32 }
 0x163   : > { %3158 = vmatpush3.bf16.msra.mxu1 (%p425_p3), %v2912_v63 }
 0x164   : >> { %v1226_v46 = vadd.f32 %v1225_v47, %v1192_v29  ;;  %3159 = vmatprep.subr.bf16.mxu1 (%p425_p3), %v3535_v61 }
 0x166   : >> { %v1227_v1 = vadd.f32 %v1226_v46, %v1193_v56 }
 0x167   : > { %3161 = vmatpush3.bf16.msra.mxu1 (%p425_p3), %v2913_v60  ;;  %v2927_v60 = vld [vmem:[#allocation12 + $0x28] sm:$0xff] (%p425_p3)  }
 0x168   : >> { %v1228_v62 = vadd.f32 %v1227_v1, %v1194_v16  ;;  %3162 = vmatprep.subr.bf16.mxu1 (%p425_p3), %v3535_v61  ;;  %v2682_v1 = vunpack.c.l.bf16 (%p425_p3), %v2924_v54  ;;  %v1585_v54 = vld [vmem:[#allocation2 + $0x38] sm:$0xff] (%p425_p3) }
 0x16a   : >> { %v1229_v51 = vadd.f32 %v1228_v62, %v1195_v3  ;;  %v2925_v62 = vld [vmem:[#allocation12 + $0x18] sm:$0xff] (%p425_p3)  }
 0x16b   : > { %3164 = vmatpush3.bf16.msra.mxu1 (%p425_p3), %v2914_v0 }
 0x16c   : >> { %v1230_v17 = vadd.f32 %v1229_v51, %v1196_v50  ;;  %3165 = vmatprep.subr.bf16.mxu1 (%p425_p3), %v3535_v61 }
 0x16e   : >> { %v1231_v48 = vrot.slane %v1230_v17, 4 }
 0x16f   : > { %3167 = vmatpush3.bf16.msra.mxu1 (%p425_p3), %v2915_v55  ;;  %v2695_v55 = vunpack.c.h.bf16 (%p425_p3), %v2927_v60 }
 0x170   : >> { %v1232_v35 = vadd.f32 %v1231_v48, %v1230_v17  ;;  %3168 = vmatprep.subr.bf16.mxu1 (%p425_p3), %v3535_v61 }
 0x172   : >> { %v1233_v53 = vrot.slane %v1232_v35, 2 }
 0x174   : >> { %v1234_v25 = vadd.f32 %v1233_v53, %v1232_v35  ;;  %v2687_v53 = vunpack.c.h.bf16 (%p425_p3), %v2925_v62 }
 0x176   : >> { %v1235_v24 = vrot.slane %v1234_v25, 1  ;;  %427 = sbr.rel (!%p425_p3) target bundleno = 168 (0xa8), region = 132 }
 0x178   : >> { %v1236_v19 = vadd.f32 %v1235_v24, %v1234_v25 }
 0x17a   : >> { %v1237_v9 = vadd.f32 %v1236_v19, %v1215_v6  ;;  %v2686_v19 = vunpack.c.l.bf16 (%p425_p3), %v2925_v62  ;;  %v2931_v62 = vld [vmem:[%s3820_s29 + $0x18] sm:$0xff] (%p425_p3)  }
 0x17c   : >> { %1238 = vst [vmem:[#allocation3] sm:$0x1] %v1237_v9  ;;  %v2926_v9 = vld [vmem:[#allocation12 + $0x20] sm:$0xff] (%p425_p3)  }
 0x17d   : > { %v2690_v63 = vunpack.c.l.bf16 %v2926_v9 }
 0x183   : > { %v1239_v37 = vld [vmem:[#allocation3] sm:$0x1] }
 0x184   : > { %v1240_v7 = vmul.f32 0.00390625, %v1239_v37 }
 0x186   : > { %3059 = vmatmul.mubr.f32.vlgmr.msra.gmra.mrb[0].mxu1 %v1240_v7 }
 0x187   : > { %3170 = vmatpush3.bf16.msra.mxu1 %v2641_v57  ;;  %3093 = vmatprep.mubr.msk.f32.mxu1 %vm3536_vm2, %v5501_v26  ;;  %v2691_v26 = vunpack.c.h.bf16 %v2926_v9 }
 0x188   : > { %3171 = vmatprep.subr.bf16.mxu1 %v3535_v61 }
 0x18b   : > { %3173 = vmatpush3.bf16.msra.mxu1 %v2916_v11 }
 0x18c   : > { %3174 = vmatprep.subr.bf16.mxu1 %v3535_v61 }
 0x18f   : > { %3176 = vmatpush3.bf16.msra.mxu1 %v2917_v30  ;;  %v2694_v30 = vunpack.c.l.bf16 %v2927_v60  ;;  %v2935_v60 = vld [vmem:[%s3820_s29 + $0x38] sm:$0xff]  }
 0x190   : > { %3177 = vmatprep.subr.bf16.mxu1 %v3535_v61 }
 0x193   : > { %3179 = vmatpush3.bf16.msra.mxu1 %v2918_v43  ;;  %v2928_v43 = vld [vmem:[#allocation12 + $0x30] sm:$0xff]  }
 0x194   : > { %3180 = vmatprep.subr.bf16.mxu1 %v3535_v61 }
 0x197   : > { %3182 = vmatpush3.bf16.msra.mxu1 %v2919_v21 }
 0x198   : > { %3183 = vmatprep.subr.bf16.mxu1 %v3535_v61 }
 0x19b   : > { %3185 = vmatpush3.bf16.msra.mxu1 %v2920_v10 }
 0x19c   : > { %3186 = vmatprep.subr.bf16.mxu1 %v3535_v61 }
 0x19f   : > { %3188 = vmatpush3.bf16.msra.mxu1 %v2921_v2  ;;  %v2699_v2 = vunpack.c.h.bf16 %v2928_v43 }
 0x1a0   : > { %3189 = vmatprep.subr.bf16.mxu1 %v3535_v61 }
 0x1a3   : > { %3191 = vmatpush3.bf16.msra.mxu1 %v2922_v49 }
 0x259   : > { %v1340_v13 = vpop.f32.mrb[0].mxu1 }
 0x25a   : > { %v1341_v18 = vadd.f32 %v1340_v13, %v1273_v28  ;;  %v3060_v52 = vpop.f32.mrb[1].mxu1 }
 0x25b   : > { %v2929_v52 = vld [vmem:[#allocation12 + $0x38] sm:$0xff]  }
 0x25c   : > { %v1344_v31 = vmax.f32 %v1341_v18, 0.0  ;;  %v2698_v18 = vunpack.c.l.bf16 %v2928_v43 }
 0x25e   : > { %3094 = vmatmul.mubr.f32.vlgmr.msra.gmra.mrb[2].mxu1 %v1344_v31 }
 0x331   : > { %v1444_v32 = vpop.f32.mrb[2].mxu1 }
 0x332   : > { %v1445_v29 = vadd.f32 %v1444_v32, %v1377_v41  ;;  %v3095_v56 = vpop.f32.mrb[3].mxu1  ;;  %v2703_v32 = vunpack.c.h.bf16 %v2929_v52 }
 0x334   : > { %v2343_v16 = vmul.f32 -1.442695, %v1445_v29 }
 0x336   : > { %3297 = vpow2.f32 %v2343_v16 }
 0x340   : > { %v3298_v3 = vpop.eup %3297 }
 0x341   : > { %v1451_v50 = vadd.f32 1.0, %v3298_v3  ;;  %v2702_v3 = vunpack.c.l.bf16 %v2929_v52 }
 0x343   : > { %3299 = vrcp.f32 %v1451_v50 }
 0x34d   : > { %v3300_v36 = vpop.eup %3299 }
 0x34e   : > { %v1489_v20 = vrot.slane %v3300_v36, %v1488_v34 }
 0x350   : > { %1499 = vbcast.lane.b32.xlu1 %v1489_v20, 272  ;;  %1491 = vbcast.lane.b32.xlu0 %v1489_v20, 256 }
 0x354   : > { %1503 = vbcast.lane.b32.xlu1 %v1489_v20, 280  ;;  %1495 = vbcast.lane.b32.xlu0 %v1489_v20, 264 }
 0x358   : > { %1511 = vbcast.lane.b32.xlu1 %v1489_v20, 296  ;;  %1507 = vbcast.lane.b32.xlu0 %v1489_v20, 288 }
 0x35c   : > { %1519 = vbcast.lane.b32.xlu1 %v1489_v20, 312  ;;  %1515 = vbcast.lane.b32.xlu0 %v1489_v20, 304 }
 0x360   : > { %1527 = vbcast.lane.b32.xlu1 %v1489_v20, 328  ;;  %1523 = vbcast.lane.b32.xlu0 %v1489_v20, 320 }
 0x364   : > { %1535 = vbcast.lane.b32.xlu1 %v1489_v20, 344  ;;  %1531 = vbcast.lane.b32.xlu0 %v1489_v20, 336 }
 0x368   : > { %1543 = vbcast.lane.b32.xlu1 %v1489_v20, 360  ;;  %1539 = vbcast.lane.b32.xlu0 %v1489_v20, 352 }
 0x36c   : > { %1551 = vbcast.lane.b32.xlu1 %v1489_v20, 376  ;;  %1547 = vbcast.lane.b32.xlu0 %v1489_v20, 368 }
 0x3c2   : > { %v1500_v8 = vpop.permute.xlu1 %1499  ;;  %v1492_v59 = vpop.permute.xlu0 %1491 }
 0x3c3   : > { %v1553_v4 = vmul.f32 %v2674_v40, %v1492_v59  ;;  %v1555_v51 = vmul.f32 %v2678_v33, %v1500_v8  ;;  %v1580_v8 = vld [vmem:[#allocation2 + $0x10] sm:$0xff]  ;;  %v1581_v59 = vld [vmem:[#allocation2 + $0x18] sm:$0xff]  ;;  %v1582_v40 = vld [vmem:[#allocation2 + $0x20] sm:$0xff] }
 0x3c4   : > { %v1586_v33 = vld [vmem:[#allocation2 + $0x40] sm:$0xff] }
 0x3c6   : > { %v1504_v14 = vpop.permute.xlu1 %1503  ;;  %v1496_v39 = vpop.permute.xlu0 %1495 }
 0x3c7   : > { %v1556_v47 = vmul.f32 %v2679_v44, %v1504_v14  ;;  %v1554_v46 = vmul.f32 %v2675_v45, %v1496_v39  ;;  %v1583_v44 = vld [vmem:[#allocation2 + $0x28] sm:$0xff]  ;;  %v1584_v45 = vld [vmem:[#allocation2 + $0x30] sm:$0xff] }
 0x3c8   : > { %v1587_v14 = vld [vmem:[#allocation2 + $0x48] sm:$0xff]  ;;  %v1588_v39 = vld [vmem:[#allocation2 + $0x50] sm:$0xff] }
 0x3c9   : > { %v1569_v17 = vpack.c.bf16 %v1554_v46, %v1553_v4  ;;  %v1570_v25 = vpack.c.bf16 %v1556_v47, %v1555_v51  ;;  %v1590_v4 = vld [vmem:[#allocation2 + $0x60] sm:$0xff]  ;;  %v1591_v47 = vld [vmem:[#allocation2 + $0x68] sm:$0xff]  ;;  %v1592_v46 = vld [vmem:[#allocation2 + $0x70] sm:$0xff] }
 0x3ca   : > { %v1512_v48 = vpop.permute.xlu1 %1511  ;;  %v1508_v35 = vpop.permute.xlu0 %1507  ;;  %v5098_v51 = vld [vmem:[%s3820_s29 + $0xc] ss:$188 sps:$4 sm:$0xff]  }
 0x3cb   : > { %v1558_v24 = vmul.f32 %v2683_v38, %v1512_v48  ;;  %v1557_v6 = vmul.f32 %v2682_v1, %v1508_v35  ;;  %3096 = vmatprep.subr.bf16.mxu0 %v1569_v17  ;;  %v1589_v38 = vld [vmem:[#allocation2 + $0x58] sm:$0xff]  ;;  %v2710_v35 = vunpack.c.l.bf16 %v2931_v62 }
 0x3cc   : > { %3097 = vmatpush3.bf16.msra.mxu0 %v1569_v17  ;;  %v1593_v1 = vld [vmem:[#allocation2 + $0x78] sm:$0xff] }
 0x3cd   : > { %3098 = vmatprep.subr.bf16.mxu0 %v1570_v25  ;;  %v1571_v27 = vpack.c.bf16 %v1558_v24, %v1557_v6  ;;  %v2930_v17 = vld [vmem:[%s3820_s29 + $0x10] sm:$0xff]   ;;  %v2932_v48 = vld [vmem:[%s3820_s29 + $0x20] sm:$0xff]   ;;  %v1847_v24 = vunpack.c.l.bf16 %v5098_v51  ;;  %v1898_v9 = vrot.slane %v2710_v35, 1 }
 0x3ce   : > { %v1520_v23 = vpop.permute.xlu1 %1519  ;;  %v1516_v61 = vpop.permute.xlu0 %1515  ;;  %v2714_v6 = vunpack.c.l.bf16 %v2932_v48  ;;  %v2715_v52 = vunpack.c.h.bf16 %v2932_v48 }
 0x3cf   : > { %v1560_v42 = vmul.f32 %v2687_v53, %v1520_v23  ;;  %v1559_v22 = vmul.f32 %v2686_v19, %v1516_v61  ;;  %v2711_v53 = vunpack.c.h.bf16 %v2931_v62  ;;  %v2707_v19 = vunpack.c.h.bf16 %v2930_v17 }
 0x3d0   : > { %3099 = vmatpush3.bf16.msra.mxu0 %v1570_v25  ;;  %v2706_v25 = vunpack.c.l.bf16 %v2930_v17  ;;  %v1895_v61 = vrot.slane %v1847_v24, 1 }
 0x3d1   : > { %3100 = vmatprep.subr.bf16.mxu0 %v1571_v27  ;;  %v1572_v7 = vpack.c.bf16 %v1560_v42, %v1559_v22  ;;  %v1899_v23 = vrot.slane %v2711_v53, 1  ;;  %v5106_v42 = vld [vmem:[%s5312_s8] ss:$0 sm:$0xff]  ;;  %v1897_v22 = vrot.slane %v2707_v19, 1 }
 0x3d2   : > { %v1528_v0 = vpop.permute.xlu1 %1527  ;;  %v1524_v37 = vpop.permute.xlu0 %1523 }
 0x3d3   : > { %v1562_v57 = vmul.f32 %v2691_v26, %v1528_v0  ;;  %v1561_v11 = vmul.f32 %v2690_v63, %v1524_v37  ;;  %v1896_v26 = vrot.slane %v2706_v25, 1  ;;  %v2934_v63 = vld [vmem:[%s3820_s29 + $0x30] sm:$0xff]   ;;  %v1975_v37 = vsel %vm545_vm0, %v1898_v9, %v1899_v23 }
 0x3d4   : > { %3101 = vmatpush3.bf16.msra.mxu0 %v1571_v27  ;;  %v1900_v27 = vrot.slane %v2714_v6, 1  ;;  %v2722_v43 = vunpack.c.l.bf16 %v2934_v63 }
 0x3d5   : > { %3102 = vmatprep.subr.bf16.mxu0 %v1572_v7  ;;  %v1573_v49 = vpack.c.bf16 %v1562_v57, %v1561_v11  ;;  %v1977_v11 = vsel %vm545_vm0, %v1895_v61, %v1896_v26 }
 0x3d6   : > { %v1536_v21 = vpop.permute.xlu1 %1535  ;;  %v1532_v10 = vpop.permute.xlu0 %1531 }
 0x3d7   : > { %v1564_v28 = vmul.f32 %v2695_v55, %v1536_v21  ;;  %v1563_v13 = vmul.f32 %v2694_v30, %v1532_v10  ;;  %v2933_v55 = vld [vmem:[%s3820_s29 + $0x28] sm:$0xff]   ;;  %v1974_v30 = vsel %vm545_vm0, %v1899_v23, %v1900_v27 }
 0x3d8   : > { %3103 = vmatpush3.bf16.msra.mxu0 %v1572_v7 }
 0x3d9   : > { %3104 = vmatprep.subr.bf16.mxu0 %v1573_v49  ;;  %v1574_v29 = vpack.c.bf16 %v1564_v28, %v1563_v13  ;;  %v2726_v28 = vunpack.c.l.bf16 %v2935_v60 }
 0x3da   : > { %v1544_v31 = vpop.permute.xlu1 %1543  ;;  %v1540_v41 = vpop.permute.xlu0 %1539 }
 0x3db   : > { %v1566_v56 = vmul.f32 %v2699_v2, %v1544_v31  ;;  %v1565_v16 = vmul.f32 %v2698_v18, %v1540_v41  ;;  %v1976_v2 = vsel %vm545_vm0, %v1896_v26, %v1897_v22  ;;  %v2718_v31 = vunpack.c.l.bf16 %v2933_v55 }
 0x3dc   : > { %3105 = vmatpush3.bf16.msra.mxu0 %v1573_v49  ;;  %v2723_v49 = vunpack.c.h.bf16 %v2934_v63  ;;  %v2719_v41 = vunpack.c.h.bf16 %v2933_v55 }
 0x3dd   : > { %3106 = vmatprep.subr.bf16.mxu0 %v1574_v29  ;;  %v1575_v36 = vpack.c.bf16 %v1566_v56, %v1565_v16  ;;  %v1904_v16 = vrot.slane %v2722_v43, 1  ;;  %v2939_v43 = vld [vmem:[%s3820_s29 + $0x58] sm:$0xff]  }
 0x3de   : > { %v1552_v50 = vpop.permute.xlu1 %1551  ;;  %v1548_v34 = vpop.permute.xlu0 %1547 }
 0x3df   : > { %v1568_v20 = vmul.f32 %v2703_v32, %v1552_v50  ;;  %v1567_v12 = vmul.f32 %v2702_v3, %v1548_v34  ;;  %v2937_v3 = vld [vmem:[%s3820_s29 + $0x48] sm:$0xff]  }
 0x3e0   : > { %3107 = vmatpush3.bf16.msra.mxu0 %v1574_v29 }
 0x3e1   : > { %3108 = vmatprep.subr.bf16.mxu0 %v1575_v36  ;;  %v1576_v58 = vpack.c.bf16 %v1568_v20, %v1567_v12  ;;  %v1906_v20 = vrot.slane %v2726_v28, 1  ;;  %v2936_v12 = vld [vmem:[%s3820_s29 + $0x40] sm:$0xff]  }
 0x3e2   : > { %v2731_v48 = vunpack.c.h.bf16 %v2936_v12 }
 0x3e4   : > { %3109 = vmatpush3.bf16.msra.mxu0 %v1575_v36  ;;  %v1905_v36 = vrot.slane %v2723_v49, 1 }
 0x3e5   : > { %3110 = vmatprep.subr.bf16.mxu0 %v1576_v58 }
 0x3e6   : > { %v1970_v17 = vsel %vm545_vm0, %v1905_v36, %v1906_v20 }
 0x3e8   : > { %3111 = vmatpush3.bf16.msra.mxu0 %v1576_v58  ;;  %v5126_v58 = vld [vmem:[%s3820_s29 + $0x50] sm:$0xff]  }
 0x3eb   : > { %3113 = vmatmul.mubr.bf16.vlgmr.msra.gmra.mrb[0].mxu0 %v1579_v5 }
 0x3ec   : > { %3116 = vmatprep.mubr.bf16.mxu0 %v1580_v8  ;;  %v1901_v8 = vrot.slane %v2715_v52, 1 }
 0x3f3   : > { %3117 = vmatmul.mubr.bf16.gmra.mrb[4].mxu0 %v1581_v59  ;;  %v1902_v59 = vrot.slane %v2718_v31, 1 }
 0x3f4   : > { %3120 = vmatprep.mubr.bf16.mxu0 %v1582_v40  ;;  %v1903_v40 = vrot.slane %v2719_v41, 1 }
 0x3f5   : > { %v1973_v35 = vsel %vm545_vm0, %v1901_v8, %v1902_v59 }
 0x3f6   : > { %v1972_v24 = vsel %vm545_vm0, %v1902_v59, %v1903_v40 }
 0x3fb   : > { %3121 = vmatmul.mubr.bf16.gmra.mrb[8].mxu0 %v1583_v44 }
 0x3fc   : > { %3124 = vmatprep.mubr.bf16.mxu0 %v1584_v45 }
 0x403   : > { %3125 = vmatmul.mubr.bf16.gmra.mrb[12].mxu0 %v1585_v54  ;;  %v2734_v54 = vunpack.c.l.bf16 %v2937_v3 }
 0x404   : > { %3128 = vmatprep.mubr.bf16.mxu0 %v1586_v33  ;;  %v2735_v33 = vunpack.c.h.bf16 %v2937_v3  ;;  %v2743_v3 = vunpack.c.h.bf16 %v2939_v43 }
 0x405   : > { %v1910_v19 = vrot.slane %v2734_v54, 1 }
 0x406   : > { %v1911_v9 = vrot.slane %v2735_v33, 1 }
 0x40b   : > { %3129 = vmatmul.mubr.bf16.gmra.mrb[16].mxu0 %v1587_v14  ;;  %v2727_v14 = vunpack.c.h.bf16 %v2935_v60 }
 0x40c   : > { %3132 = vmatprep.mubr.bf16.mxu0 %v1588_v39 }
 0x40d   : > { %v1907_v23 = vrot.slane %v2727_v14, 1  ;;  %v1915_v14 = vrot.slane %v2743_v3, 1 }
 0x413   : > { %3133 = vmatmul.mubr.bf16.gmra.mrb[20].mxu0 %v1589_v38 }
 0x414   : > { %3136 = vmatprep.mubr.bf16.mxu0 %v1590_v4  ;;  %v2730_v4 = vunpack.c.l.bf16 %v2936_v12  ;;  %v2943_v12 = vld [vmem:[%s3820_s29 + $0x78] sm:$0xff]  }
 0x416   : > { %v1908_v27 = vrot.slane %v2730_v4, 1  ;;  %v2758_v4 = vunpack.c.l.bf16 %v2943_v12 }
 0x41b   : > { %3137 = vmatmul.mubr.bf16.gmra.mrb[24].mxu0 %v1591_v47  ;;  %v2738_v47 = vunpack.c.l.bf16 %v5126_v58 }
 0x41c   : > { %3140 = vmatprep.mubr.bf16.mxu0 %v1592_v46  ;;  %v1971_v46 = vsel %vm545_vm0, %v1904_v16, %v1905_v36  ;;  %v2742_v16 = vunpack.c.l.bf16 %v2939_v43 }
 0x41d   : > { %v1912_v22 = vrot.slane %v2738_v47, 1  ;;  %v2759_v47 = vunpack.c.h.bf16 %v2943_v12 }
 0x41f   : > { %v1966_v49 = vsel %vm545_vm0, %v1911_v9, %v1912_v22  ;;  %v1923_v22 = vrot.slane %v2759_v47, 1 }
 0x423   : > { %3141 = vmatmul.mubr.bf16.gmra.mrb[28].mxu0 %v1593_v1 }
 0x4be   : > { %v3114_v0 = vpop.f32.mrb[0].mxu0 }
 0x4bf   : > { %v1763_v7 = vadd.f32 %v3114_v0, %v5106_v42  ;;  %v1628_v57 = vpop.f32.mrb[1].mxu0  ;;  %v1909_v0 = vrot.slane %v2731_v48, 1 }
 0x4c0   : > { %v1761_v21 = vadd.f32 %v5106_v42, %v1628_v57  ;;  %v3115_v10 = vpop.f32.mrb[2].mxu0 }
 0x4c1   : > { %v1764_v13 = vadd.f32 %v3115_v10, %v5106_v42  ;;  %v1631_v18 = vpop.f32.mrb[3].mxu0  ;;  %v1980_v29 = vadd.f32 %v1975_v37, %v1763_v7  ;;  %v2940_v37 = vld [vmem:[%s3820_s29 + $0x60] sm:$0xff]   ;;  %v2941_v7 = vld [vmem:[%s3820_s29 + $0x68] sm:$0xff]   ;;  %v1968_v52 = vsel %vm545_vm0, %v1908_v27, %v1909_v0 }
 0x4c2   : > { %v1762_v32 = vadd.f32 %v5106_v42, %v1631_v18  ;;  %v1978_v50 = vadd.f32 %v1977_v11, %v1761_v21  ;;  %v2746_v28 = vunpack.c.l.bf16 %v2940_v37  ;;  %v2747_v31 = vunpack.c.h.bf16 %v2940_v37 }
 0x4c3   : > { %v1981_v56 = vadd.f32 %v1974_v30, %v1764_v13  ;;  %v1967_v30 = vsel %vm545_vm0, %v1910_v19, %v1911_v9  ;;  %v2750_v41 = vunpack.c.l.bf16 %v2941_v7 }
 0x4c4   : > { %v1979_v34 = vadd.f32 %v1976_v2, %v1762_v32  ;;  %v1969_v2 = vsel %vm545_vm0, %v1907_v23, %v1908_v27  ;;  %v1916_v20 = vrot.slane %v2746_v28, 1  ;;  %v1917_v59 = vrot.slane %v2747_v31, 1  ;;  %v2945_v28 = vld [vmem:[%s3820_s29 + $0x88] sm:$0xff]  }
 0x4c5   : > { %v2804_v5 = vpack.c.bf16 %v1981_v56, %v1980_v29  ;;  %v2739_v56 = vunpack.c.h.bf16 %v5126_v58  ;;  %v1918_v40 = vrot.slane %v2750_v41, 1  ;;  %v1914_v58 = vrot.slane %v2742_v16, 1 }
 0x4c6   : > { %v2799_v44 = vpack.c.bf16 %v1979_v34, %v1978_v50  ;;  %v3118_v45 = vpop.f32.mrb[4].mxu0  ;;  %v1922_v27 = vrot.slane %v2758_v4, 1  ;;  %v2767_v12 = vunpack.c.h.bf16 %v2945_v28 }
 0x4c7   : > { %2953 = vst [vmem:[%s3859_s24 + $0x8] sm:$0xff] %v2804_v5   ;;  %v1767_v39 = vadd.f32 %v3118_v45, %v5106_v42  ;;  %v1644_v38 = vpop.f32.mrb[5].mxu0  ;;  %v5164_v45 = vld [vmem:[%s3820_s29 + $0x80] sm:$0xff]   ;;  %v1913_v33 = vrot.slane %v2739_v56, 1 }
 0x4c8   : > { %2800 = vst [vmem:[%s3859_s24] sm:$0xff] %v2799_v44   ;;  %v1765_v1 = vadd.f32 %v5106_v42, %v1644_v38  ;;  %v3119_v62 = vpop.f32.mrb[6].mxu0  ;;  %v2942_v44 = vld [vmem:[%s3820_s29 + $0x70] sm:$0xff]   ;;  %v2762_v48 = vunpack.c.l.bf16 %v5164_v45 }
 0x4c9   : > { %v1768_v53 = vadd.f32 %v3119_v62, %v5106_v42  ;;  %v1647_v25 = vpop.f32.mrb[7].mxu0  ;;  %v1984_v61 = vadd.f32 %v1971_v46, %v1767_v39  ;;  %v2751_v46 = vunpack.c.h.bf16 %v2941_v7  ;;  %v1965_v19 = vsel %vm545_vm0, %v1913_v33, %v1914_v58 }
 0x4ca   : > { %v1766_v6 = vadd.f32 %v5106_v42, %v1647_v25  ;;  %v1982_v63 = vadd.f32 %v1973_v35, %v1765_v1  ;;  %v1963_v35 = vsel %vm545_vm0, %v1916_v20, %v1917_v59  ;;  %v2766_v20 = vunpack.c.l.bf16 %v2945_v28 }
 0x4cb   : > { %v1985_v26 = vadd.f32 %v1970_v17, %v1768_v53  ;;  %v2754_v17 = vunpack.c.l.bf16 %v2942_v44 }
 0x4cc   : > { %v1983_v60 = vadd.f32 %v1972_v24, %v1766_v6  ;;  %v1962_v24 = vsel %vm545_vm0, %v1917_v59, %v1918_v40  ;;  %v2755_v6 = vunpack.c.h.bf16 %v2942_v44  ;;  %v2949_v44 = vld [vmem:[%s3820_s29 + $0xa8] sm:$0xff]  }
 0x4cd   : > { %v2814_v55 = vpack.c.bf16 %v1985_v26, %v1984_v61  ;;  %v1964_v61 = vsel %vm545_vm0, %v1914_v58, %v1915_v14  ;;  %v1920_v37 = vrot.slane %v2754_v17, 1  ;;  %v2782_v17 = vunpack.c.l.bf16 %v2949_v44 }
 0x4ce   : > { %v2809_v57 = vpack.c.bf16 %v1983_v60, %v1982_v63  ;;  %v3122_v11 = vpop.f32.mrb[8].mxu0  ;;  %v1919_v63 = vrot.slane %v2751_v46, 1  ;;  %v1927_v46 = vrot.slane %v2767_v12, 1 }
 0x4cf   : > { %2955 = vst [vmem:[%s3859_s24 + $0x18] sm:$0xff] %v2814_v55   ;;  %v1771_v21 = vadd.f32 %v3122_v11, %v5106_v42  ;;  %v1660_v10 = vpop.f32.mrb[9].mxu0  ;;  %v1924_v55 = vrot.slane %v2762_v48, 1  ;;  %v1921_v11 = vrot.slane %v2755_v6, 1  ;;  %v2783_v48 = vunpack.c.h.bf16 %v2949_v44 }
 0x4d0   : > { %2954 = vst [vmem:[%s3859_s24 + $0x10] sm:$0xff] %v2809_v57   ;;  %v1769_v13 = vadd.f32 %v5106_v42, %v1660_v10  ;;  %v3123_v18 = vpop.f32.mrb[10].mxu0 }
 0x4d1   : > { %v1772_v32 = vadd.f32 %v3123_v18, %v5106_v42  ;;  %v1663_v29 = vpop.f32.mrb[11].mxu0  ;;  %v1988_v34 = vadd.f32 %v1967_v30, %v1771_v21  ;;  %v2946_v30 = vld [vmem:[%s3820_s29 + $0x90] sm:$0xff]   ;;  %v2947_v21 = vld [vmem:[%s3820_s29 + $0x98] sm:$0xff]   ;;  %v1958_v31 = vsel %vm545_vm0, %v1923_v22, %v1924_v55  ;;  %v1960_v56 = vsel %vm545_vm0, %v1920_v37, %v1921_v11 }
 0x4d2   : > { %v1770_v50 = vadd.f32 %v5106_v42, %v1663_v29  ;;  %v1986_v5 = vadd.f32 %v1969_v2, %v1769_v13  ;;  %v2770_v41 = vunpack.c.l.bf16 %v2946_v30  ;;  %v2771_v16 = vunpack.c.h.bf16 %v2946_v30 }
 0x4d3   : > { %v1989_v36 = vadd.f32 %v1966_v49, %v1772_v32  ;;  %v1959_v49 = vsel %vm545_vm0, %v1922_v27, %v1923_v22  ;;  %v2774_v3 = vunpack.c.l.bf16 %v2947_v21  ;;  %v1935_v55 = vrot.slane %v2783_v48, 1 }
 0x4d4   : > { %v1987_v8 = vadd.f32 %v1968_v52, %v1770_v50  ;;  %v1961_v52 = vsel %vm545_vm0, %v1919_v63, %v1920_v37  ;;  %v1928_v40 = vrot.slane %v2770_v41, 1  ;;  %v1929_v58 = vrot.slane %v2771_v16, 1 }
 0x4d5   : > { %v2824_v54 = vpack.c.bf16 %v1989_v36, %v1988_v34  ;;  %v2763_v36 = vunpack.c.h.bf16 %v5164_v45  ;;  %v1930_v14 = vrot.slane %v2774_v3, 1  ;;  %v1926_v45 = vrot.slane %v2766_v20, 1 }
 0x4d6   : > { %v2819_v39 = vpack.c.bf16 %v1987_v8, %v1986_v5  ;;  %v3126_v38 = vpop.f32.mrb[12].mxu0  ;;  %v1934_v37 = vrot.slane %v2782_v17, 1  ;;  %v1894_v20 = vunpack.c.h.bf16 %v5098_v51 }
 0x4d7   : > { %2957 = vst [vmem:[%s3859_s24 + $0x28] sm:$0xff] %v2824_v54   ;;  %v1775_v1 = vadd.f32 %v3126_v38, %v5106_v42  ;;  %v1676_v62 = vpop.f32.mrb[13].mxu0  ;;  %v5202_v38 = vld [vmem:[%s3820_s29 + $0xb0] sm:$0xff]   ;;  %v1925_v47 = vrot.slane %v2763_v36, 1 }
 0x4d8   : > { %2956 = vst [vmem:[%s3859_s24 + $0x20] sm:$0xff] %v2819_v39   ;;  %v1773_v53 = vadd.f32 %v5106_v42, %v1676_v62  ;;  %v3127_v25 = vpop.f32.mrb[14].mxu0  ;;  %v2948_v39 = vld [vmem:[%s3820_s29 + $0xa0] sm:$0xff]   ;;  %v2786_v6 = vunpack.c.l.bf16 %v5202_v38 }
 0x4d9   : > { %v1776_v9 = vadd.f32 %v3127_v25, %v5106_v42  ;;  %v1679_v23 = vpop.f32.mrb[15].mxu0  ;;  %v1992_v60 = vadd.f32 %v1963_v35, %v1775_v1  ;;  %v2775_v35 = vunpack.c.h.bf16 %v2947_v21  ;;  %v1957_v27 = vsel %vm545_vm0, %v1925_v47, %v1926_v45 }
 0x4da   : > { %v1774_v26 = vadd.f32 %v5106_v42, %v1679_v23  ;;  %v1990_v7 = vadd.f32 %v1965_v19, %v1773_v53  ;;  %v1955_v19 = vsel %vm545_vm0, %v1928_v40, %v1929_v58  ;;  %v1942_v47 = vrot.slane %v1894_v20, 1 }
 0x4db   : > { %v1993_v0 = vadd.f32 %v1962_v24, %v1776_v9  ;;  %v2778_v24 = vunpack.c.l.bf16 %v2948_v39 }
 0x4dc   : > { %v1991_v57 = vadd.f32 %v1964_v61, %v1774_v26  ;;  %v1954_v61 = vsel %vm545_vm0, %v1929_v58, %v1930_v14  ;;  %v2779_v26 = vunpack.c.h.bf16 %v2948_v39 }
 0x4dd   : > { %v2834_v43 = vpack.c.bf16 %v1993_v0, %v1992_v60  ;;  %v1956_v60 = vsel %vm545_vm0, %v1926_v45, %v1927_v46  ;;  %v1932_v30 = vrot.slane %v2778_v24, 1 }
 0x4de   : > { %v2829_v10 = vpack.c.bf16 %v1991_v57, %v1990_v7  ;;  %v3130_v2 = vpop.f32.mrb[16].mxu0  ;;  %v1931_v7 = vrot.slane %v2775_v35, 1 }
 0x4df   : > { %2959 = vst [vmem:[%s3859_s24 + $0x38] sm:$0xff] %v2834_v43   ;;  %v1779_v13 = vadd.f32 %v3130_v2, %v5106_v42  ;;  %v1692_v18 = vpop.f32.mrb[17].mxu0  ;;  %v1936_v43 = vrot.slane %v2786_v6, 1  ;;  %v1933_v2 = vrot.slane %v2779_v26, 1 }
 0x4e0   : > { %2958 = vst [vmem:[%s3859_s24 + $0x30] sm:$0xff] %v2829_v10   ;;  %v1777_v32 = vadd.f32 %v5106_v42, %v1692_v18  ;;  %v3131_v29 = vpop.f32.mrb[18].mxu0 }
 0x4e1   : > { %v1780_v50 = vadd.f32 %v3131_v29, %v5106_v42  ;;  %v1695_v34 = vpop.f32.mrb[19].mxu0  ;;  %v1996_v8 = vadd.f32 %v1959_v49, %v1779_v13  ;;  %v2952_v49 = vld [vmem:[%s3820_s29 + $0xc0] sm:$0xff]   ;;  %v1953_v29 = vsel %vm545_vm0, %v1931_v7, %v1932_v30 }
 0x4e2   : > { %v1778_v5 = vadd.f32 %v5106_v42, %v1695_v34  ;;  %v1994_v54 = vadd.f32 %v1961_v52, %v1777_v32  ;;  %v1951_v52 = vsel %vm545_vm0, %v1934_v37, %v1935_v55  ;;  %v2794_v16 = vunpack.c.l.bf16 %v2952_v49 }
 0x4e3   : > { %v1997_v59 = vadd.f32 %v1958_v31, %v1780_v50  ;;  %v2951_v31 = vld [vmem:[%s3820_s29 + $0xb8] sm:$0xff]   ;;  %v1952_v34 = vsel %vm545_vm0, %v1932_v30, %v1933_v2  ;;  %v2795_v36 = vunpack.c.h.bf16 %v2952_v49  ;;  %s2463_s29 = sshll.u32 %s3611_s13, 11  ;;  %s2174_s13 = scalar_lea.sflag [#allocation6], %s3816_s16 }
 0x4e4   : > { %v1995_v33 = vadd.f32 %v1960_v56, %v1778_v5  ;;  %v1950_v56 = vsel %vm545_vm0, %v1935_v55, %v1936_v43  ;;  %v2791_v40 = vunpack.c.h.bf16 %v2951_v31  ;;  %v1940_v58 = vrot.slane %v2794_v16, 1  ;;  %s5256_s26 = scalar_lea.hbm %s5502_s25, %s2463_s29 }
 0x4e5   : > { %v2844_v4 = vpack.c.bf16 %v1997_v59, %v1996_v8  ;;  %v2787_v8 = vunpack.c.h.bf16 %v5202_v38  ;;  %v2790_v59 = vunpack.c.l.bf16 %v2951_v31 }
 0x4e6   : > { %v2839_v1 = vpack.c.bf16 %v1995_v33, %v1994_v54  ;;  %v3134_v62 = vpop.f32.mrb[20].mxu0 }
 0x4e7   : > { %2961 = vst [vmem:[%s3859_s24 + $0x48] sm:$0xff] %v2844_v4   ;;  %v1783_v53 = vadd.f32 %v3134_v62, %v5106_v42  ;;  %v1708_v25 = vpop.f32.mrb[21].mxu0  ;;  %v1941_v4 = vrot.slane %v2795_v36, 1  ;;  %v1937_v51 = vrot.slane %v2787_v8, 1  ;;  %v1938_v46 = vrot.slane %v2790_v59, 1 }
 0x4e8   : > { %2960 = vst [vmem:[%s3859_s24 + $0x40] sm:$0xff] %v2839_v1   ;;  %v1781_v9 = vadd.f32 %v5106_v42, %v1708_v25  ;;  %v3135_v23 = vpop.f32.mrb[22].mxu0  ;;  %v1939_v1 = vrot.slane %v2791_v40, 1 }
 0x4e9   : > { %v1784_v22 = vadd.f32 %v3135_v23, %v5106_v42  ;;  %v1711_v63 = vpop.f32.mrb[23].mxu0  ;;  %v2000_v57 = vadd.f32 %v1955_v19, %v1783_v53  ;;  %v1947_v35 = vsel %vm545_vm0, %v1940_v58, %v1941_v4  ;;  %v1946_v24 = vsel %vm545_vm0, %v1941_v4, %v1942_v47 }
 0x4ea   : > { %v1782_v0 = vadd.f32 %v5106_v42, %v1711_v63  ;;  %v1998_v21 = vadd.f32 %v1957_v27, %v1781_v9  ;;  %v1949_v6 = vsel %vm545_vm0, %v1937_v51, %v1938_v46  ;;  %v1948_v23 = vsel %vm545_vm0, %v1938_v46, %v1939_v1 }
 0x4eb   : > { %v2001_v11 = vadd.f32 %v1954_v61, %v1784_v22 }
 0x4ec   : > { %v1999_v10 = vadd.f32 %v1956_v60, %v1782_v0 }
 0x4ed   : > { %v2854_v28 = vpack.c.bf16 %v2001_v11, %v2000_v57 }
 0x4ee   : > { %v2849_v13 = vpack.c.bf16 %v1999_v10, %v1998_v21  ;;  %v3138_v18 = vpop.f32.mrb[24].mxu0 }
 0x4ef   : > { %2963 = vst [vmem:[%s3859_s24 + $0x58] sm:$0xff] %v2854_v28   ;;  %v1787_v41 = vadd.f32 %v3138_v18, %v5106_v42  ;;  %v1724_v32 = vpop.f32.mrb[25].mxu0 }
 0x4f0   : > { %2962 = vst [vmem:[%s3859_s24 + $0x50] sm:$0xff] %v2849_v13   ;;  %v1785_v3 = vadd.f32 %v5106_v42, %v1724_v32  ;;  %v3139_v50 = vpop.f32.mrb[26].mxu0 }
 0x4f1   : > { %v1788_v12 = vadd.f32 %v3139_v50, %v5106_v42  ;;  %v1727_v5 = vpop.f32.mrb[27].mxu0  ;;  %v2004_v54 = vadd.f32 %v1951_v52, %v1787_v41 }
 0x4f2   : > { %v1786_v44 = vadd.f32 %v5106_v42, %v1727_v5  ;;  %v2002_v14 = vadd.f32 %v1953_v29, %v1785_v3 }
 0x4f3   : > { %v2005_v33 = vadd.f32 %v1950_v56, %v1788_v12 }
 0x4f4   : > { %v2003_v39 = vadd.f32 %v1952_v34, %v1786_v44 }
 0x4f5   : > { %v2864_v45 = vpack.c.bf16 %v2005_v33, %v2004_v54 }
 0x4f6   : > { %v2859_v62 = vpack.c.bf16 %v2003_v39, %v2002_v14  ;;  %v3142_v38 = vpop.f32.mrb[28].mxu0 }
 0x4f7   : > { %2965 = vst [vmem:[%s3859_s24 + $0x68] sm:$0xff] %v2864_v45   ;;  %v1791_v17 = vadd.f32 %v3142_v38, %v5106_v42  ;;  %v1740_v48 = vpop.f32.mrb[29].mxu0 }
 0x4f8   : > { %2964 = vst [vmem:[%s3859_s24 + $0x60] sm:$0xff] %v2859_v62   ;;  %v1789_v53 = vadd.f32 %v5106_v42, %v1740_v48  ;;  %v3143_v25 = vpop.f32.mrb[30].mxu0 }
 0x4f9   : > { %v1792_v19 = vadd.f32 %v3143_v25, %v5106_v42  ;;  %v1743_v9 = vpop.f32.mrb[31].mxu0  ;;  %v2008_v26 = vadd.f32 %v1947_v35, %v1791_v17 }
 0x4fa   : > { %v1790_v61 = vadd.f32 %v5106_v42, %v1743_v9  ;;  %v2006_v22 = vadd.f32 %v1949_v6, %v1789_v53 }
 0x4fb   : > { %v2009_v27 = vadd.f32 %v1946_v24, %v1792_v19 }
 0x4fc   : > { %v2007_v63 = vadd.f32 %v1948_v23, %v1790_v61 }
 0x4fd   : > { %v2874_v60 = vpack.c.bf16 %v2009_v27, %v2008_v26 }
 0x4fe   : > { %v2869_v15 = vpack.c.bf16 %v2007_v63, %v2006_v22 }
 0x4ff   : > { %2967 = vst [vmem:[%s3859_s24 + $0x78] sm:$0xff] %v2874_v60  }
 0x500   : > { %2966 = vst [vmem:[%s3859_s24 + $0x70] sm:$0xff] %v2869_v15  }
 0x501   : > { %3456 = shalt.err (!%p3453_p9)
}
 0x502   : > { %s3457_s24 = scalar_lea.hbm %s5256_s26, 2048  ;;  %s3461_s15 = scalar_lea.hbm %s5502_s25, 4096 }
 0x503   : > { %p3458_p0 = scmp.ne.s32.totalorder %s5256_s26, %s3457_s24  ;;  %p3462_p8 = scmp.lt.u32.totalorder %s5256_s26, %s5502_s25 }
 0x504   : > { %p3463_p6 = scmp.lt.u32.totalorder %s3461_s15, %s3457_s24  ;;  %p3465_p5 = scmp.lt.u32.totalorder %s3457_s24, %s5256_s26 }
 0x505   : > { %p3459_p11 = pnand %p3458_p0, %p3761_p10 }
 0x506   : > { %p3464_p3 = por %p3463_p6, %p3462_p8 }
 0x507   : > { %p3460_p4 = pneg %p3459_p11 }
 0x508   : > { %p3466_p7 = por %p3465_p5, %p3464_p3 }
 0x50a   : > { %p3467_p12 = pnand %p3466_p7, %p3460_p4 }
 0x50c   : > { %3470 = shalt.err (!%p3467_p12)
}
 0x50d   : > { %s3538_s22 = smov 64   ;;  %s3539_s30 = smov 4  }
 0x50e   : > { %3213 = dma.vmem_to_hbm [thread:$0]  (%p3761_p10), %s5258_s20, 2048, %s5256_s26, %s2174_s13, %s3538_s22, %s3538_s22, %s3539_s30  }
 0x50f PF: > { %s5503_s9 = sld [smem:[#allocation18_spill]]  ;;  %s5504_s23 = sld [smem:[#allocation19_spill]] }
 0x510   : > { %p5506_p2 = scmp.ge.s32.totalorder %s3521_s12, 2 }
 0x515   : > { %s2202_s19 = sand.u32 1, %s5503_s9   ;;  %p5505_p1 = scmp.ne.s32.totalorder %s5504_s23, 0 }
 0x516   : > { %s2203_s24 = scalar_lea.sflag [#allocation6], %s2202_s19 }
 0x517   : > { %p3233_p13 = pnand %p5506_p2, %p5505_p1 }
 0x519   : > { %3504 = dma.done.wait (!%p3233_p13), %s2203_s24, 2048  }
 0x51a   : > { %3506 = vsyncadd (!%p3233_p13), %s2203_s24, 4294965248  ;;  %p24_p9 = scmp.ge.s32.totalorder %s3751_s14, 4   ;;  %s5507_s30 = smov %s3513_s10 }
 0x51b   : > { %s5508_s10 = smov %s3517_s11  ;;  %s5509_s11 = smov %s3767_s28 }
 0x51c   : > { %s5510_s12 = smov %s3751_s14  ;;  %26 = sbr.rel (!%p24_p9) target bundleno = 9 (0x9), region = 143 }
 0x523   :  { %2208 = vsyncpa [#allocation5], 1 }
 0x524   :  { %2210 = vsyncpa [#allocation5 + $0x1], 1 }
 0x525   :  { %2211 = vsyncpa [#allocation8], 1 }
 0x526   :  { %2212 = vsyncpa [#allocation11], 1 }
 0x527   :  { %2213 = vsyncpa [#allocation6], 1 }
 0x528   :  { %2215 = vsyncpa [#allocation6 + $0x1], 1 }

</bundles_post_ra>
